<compile_context>
chip_gen: v6e
topology: v6e:2x2x1
jax: 0.10.0
libtpu: 0.0.40
codegen_flags: <defaults>
</compile_context>

<pallas_src>
import jax
import jax.numpy as jnp
from jax.experimental import pallas as pl
from jax.experimental.pallas import tpu as pltpu

RBF_SIGMA = 1.0      # stand-in for models.<opts.gaussian_sigma>()
EPSILON = 0.05
DELTA = 0.01         # opts.delta
GAMMA = 1.0          # opts.gamma

_PAD_SQNORM = 1e30   # sentinel squared-norm for padded rows/cols -> kz underflows to 0


def _round_up(a, b):
    return (a + b - 1) // b * b


# --------------------------------------------------------------------------- #
# Plain-JAX helpers for the theta-independent (loop-invariant) pieces.
# --------------------------------------------------------------------------- #
def _rbf_gram(v, sigma=RBF_SIGMA):
    """RBF Gram exp(-||vi - vj||^2 / (2 sigma^2)) for v: (n, d) f32."""
    sq = jnp.sum(v * v, axis=-1, keepdims=True)                       # (n, 1)
    d2 = jnp.maximum(sq + sq.T - 2.0 * (v @ v.T), 0.0)
    return jnp.exp(-d2 / (2.0 * sigma * sigma))


def _center(k):
    """Double-center a Gram matrix: H K H with H = I - 11^T/n."""
    return (k - jnp.mean(k, axis=1, keepdims=True)
              - jnp.mean(k, axis=0, keepdims=True)
              + jnp.mean(k))


# --------------------------------------------------------------------------- #
# Pallas kernel: one (T, T) tile of the theta-dependent Gram Kz per grid step,
# with fused per-tile partial reductions accumulated across the j sweep.
# --------------------------------------------------------------------------- #
def _fill(ref, val):
    """Broadcast a scalar value across a small lane-dense output block."""
    ref[...] = jnp.full(ref.shape, val, dtype=ref.dtype)


def gdopt_kernel(zi_ref, zj_ref, sqc_ref, sqr_ref, ks_ref, ky_ref,
                 num_s_ref, num_y_ref, kzsq_ref, rsq_ref, rsum_ref,
                 s_ns, s_ny, s_kq, r_acc):
    j = pl.program_id(1)
    nj = pl.num_programs(1)

    @pl.when(j == 0)
    def _():
        s_ns[...] = jnp.zeros_like(s_ns)
        s_ny[...] = jnp.zeros_like(s_ny)
        s_kq[...] = jnp.zeros_like(s_kq)
        r_acc[...] = jnp.zeros_like(r_acc)

    # cross = z_i @ z_j.T — the only MXU contraction (K = feature dim, tiny here,
    # so operands stay in their native dtype; f32 accumulation).
    cross = jax.lax.dot_general(zi_ref[...], zj_ref[...],
                                (((1,), (1,)), ((), ())),
                                preferred_element_type=jnp.float32)    # (T, T)
    # sq_col (T,1) + sq_row (1,T): free VPU broadcasts, no in-kernel reduce of z.
    d2 = jnp.maximum(sqc_ref[...] + sqr_ref[...] - 2.0 * cross, 0.0)
    kz = jnp.exp(d2 * (-1.0 / (2.0 * RBF_SIGMA * RBF_SIGMA)))          # EUP hot loop

    # Fused single pass over the kz tile: all four reductions while it is live.
    # (.astype(f32) is a no-op for f32 grams; enables a bf16-streaming variant.)
    s_ns[...] += jnp.sum(kz * ks_ref[...].astype(jnp.float32))
    s_ny[...] += jnp.sum(kz * ky_ref[...].astype(jnp.float32))
    s_kq[...] += jnp.sum(kz * kz)
    r_acc[...] += jnp.sum(kz, axis=1, keepdims=True)                   # (T, 1)

    @pl.when(j == nj - 1)
    def _():
        rv = r_acc[...]
        _fill(num_s_ref, s_ns[0, 0])
        _fill(num_y_ref, s_ny[0, 0])
        _fill(kzsq_ref, s_kq[0, 0])
        _fill(rsq_ref, jnp.sum(rv * rv))
        _fill(rsum_ref, jnp.sum(rv))


def _gdopt_pallas(z, ks_c, ky_c, n):
    """Returns (sum(Kz*Ks_c), sum(Kz*Ky_c), ||H Kz H||_F^2) for the real n samples."""
    k = z.shape[1]
    n_pad = _round_up(max(n, 8), 128)
    tile = next(t for t in (512, 256, 128) if n_pad % t == 0)
    g = n_pad // tile
    pad = n_pad - n

    # Pad: Gram tiles with zeros, squared norms with a huge sentinel so every
    # padded Kz entry underflows to exactly 0 and drops out of all reductions.
    sq = jnp.sum(z * z, axis=-1)                                       # (n,)
    sq_p = jnp.pad(sq, (0, pad), constant_values=_PAD_SQNORM)
    z_p = jnp.pad(z, ((0, pad), (0, 0)))
    ks_p = jnp.pad(ks_c, ((0, pad), (0, pad)))
    ky_p = jnp.pad(ky_c, ((0, pad), (0, pad)))
    sq_col = sq_p[:, None]                                             # (n_pad, 1)
    sq_row = sq_p[None, :]                                             # (1, n_pad)

    part_shape = jax.ShapeDtypeStruct((g, 1, 128), jnp.float32)        # lane-dense partials
    part_spec = pl.BlockSpec((1, 1, 128), lambda i, j: (i, 0, 0))

    grid_spec = pltpu.PrefetchScalarGridSpec(
        num_scalar_prefetch=0,
        grid=(g, g),
        in_specs=[
            pl.BlockSpec((tile, k), lambda i, j: (i, 0)),      # z rows   (resident over j)
            pl.BlockSpec((tile, k), lambda i, j: (j, 0)),      # z cols
            pl.BlockSpec((tile, 1), lambda i, j: (i, 0)),      # sq_col   (resident over j)
            pl.BlockSpec((1, tile), lambda i, j: (0, j)),      # sq_row
            pl.BlockSpec((tile, tile), lambda i, j: (i, j)),   # Ks_c tile
            pl.BlockSpec((tile, tile), lambda i, j: (i, j)),   # Ky_c tile
        ],
        out_specs=(part_spec,) * 5,
        scratch_shapes=[pltpu.VMEM((1, 1), jnp.float32),
                        pltpu.VMEM((1, 1), jnp.float32),
                        pltpu.VMEM((1, 1), jnp.float32),
                        pltpu.VMEM((tile, 1), jnp.float32)],
    )

    # Small per-tile VMEM budget; never ask for more than 48 MiB (v7x headroom).
    vmem_bytes = int(min(48 * 1024 * 1024, max(24 * 1024 * 1024, 48 * tile * tile)))

    num_s_p, num_y_p, kzsq_p, rsq_p, rsum_p = pl.pallas_call(
        gdopt_kernel,
        grid_spec=grid_spec,
        out_shape=(part_shape,) * 5,
        compiler_params=pltpu.CompilerParams(
            dimension_semantics=("parallel", "arbitrary"),
            vmem_limit_bytes=vmem_bytes),
    )(z_p, z_p, sq_col, sq_row, ks_p, ky_p)

    num_s = jnp.sum(num_s_p[:, 0, 0])
    num_y = jnp.sum(num_y_p[:, 0, 0])
    kzsq = jnp.sum(kzsq_p[:, 0, 0])
    rsq = jnp.sum(rsq_p[:, 0, 0])
    rsum = jnp.sum(rsum_p[:, 0, 0])

    # HSIC identity: ||H Kz H||_F^2 = sum(Kz^2) - (2/n) * sum_i (Kz 1)_i^2 + (1'Kz1)^2 / n^2
    nf = jnp.float32(n)
    kz_c_sq = kzsq - (2.0 / nf) * rsq + (rsum * rsum) / (nf * nf)
    return num_s, num_y, jnp.maximum(kz_c_sq, 0.0)


# --------------------------------------------------------------------------- #
# Full GDOPT.forward: obj = T1 + T8.
# --------------------------------------------------------------------------- #
def gdopt_forward(x, theta, s, y, *, epsilon=EPSILON, delta=DELTA, gamma=GAMMA):
    n = x.shape[0]

    # torch.mm(x, theta): native-dtype operands straight to the MXU, f32 accumulate.
    z = jnp.dot(x, theta, preferred_element_type=jnp.float32)          # (n, k) f32

    # theta-independent (loop-invariant in training): centered Grams of s and y
    # plus their Frobenius norms, hoisted out of the kernel.
    ks_c = _center(_rbf_gram(s.astype(jnp.float32)))
    ky_c = _center(_rbf_gram(y.astype(jnp.float32)))
    ks_sq = jnp.sum(ks_c * ks_c)
    ky_sq = jnp.sum(ky_c * ky_c)

    num_s, num_y, kz_sq = _gdopt_pallas(z, ks_c, ky_c, n)

    dep_s = num_s / (jnp.sqrt(kz_sq * ks_sq) + 1e-12)
    dep_y = num_y / (jnp.sqrt(kz_sq * ky_sq) + 1e-12)

    # scalar glue (matches the PyTorch barrier / objective arithmetic)
    w = jnp.float32(epsilon) - dep_s
    t1 = -dep_y
    # barrier_func_sq_tol(w)
    t8 = jnp.where(
        jnp.abs(w) > delta,
        gamma * jnp.square(w) / (2.0 * delta) + gamma * delta / 2.0,
        gamma * jnp.abs(w),
    )
    return t1 + t8


# --------------------------------------------------------------------------- #
# Pure-JAX reference (explicit centered Grams) for a sanity check.
# --------------------------------------------------------------------------- #
def _gdopt_reference(x, theta, s, y, epsilon=EPSILON, delta=DELTA, gamma=GAMMA):
    z = jnp.dot(x.astype(jnp.float32), theta.astype(jnp.float32))
    kz_c = _center(_rbf_gram(z))
    ks_c = _center(_rbf_gram(s.astype(jnp.float32)))
    ky_c = _center(_rbf_gram(y.astype(jnp.float32)))

    def cka(a, b):
        return jnp.sum(a * b) / (jnp.sqrt(jnp.sum(a * a) * jnp.sum(b * b)) + 1e-12)

    dep_s = cka(kz_c, ks_c)
    dep_y = cka(kz_c, ky_c)
    w = epsilon - dep_s
    t8 = jnp.where(jnp.abs(w) > delta,
                   gamma * jnp.square(w) / (2.0 * delta) + gamma * delta / 2.0,
                   gamma * jnp.abs(w))
    return -dep_y + t8


if __name__ == "__main__":
    key = jax.random.PRNGKey(0)
    k_x, k_t, k_s, k_y, k_x2, k_s2, k_y2, _ = jax.random.split(key, 8)

    # Small shapes consistent with the module: K_Z is (n, m), theta is (m, d_out),
    # s and y are per-sample scalars.
    n, m, d_out = 32, 32, 8
    x = jax.random.normal(k_x, (n, m), dtype=jnp.float32)                 # K_Z-style input
    theta = 0.1 * jax.random.normal(k_t, (m, d_out), dtype=jnp.float32)   # nn.Parameter(theta)
    s = (jax.random.uniform(k_s, (n, 1)) > 0.5).astype(jnp.float32)       # sensitive attribute
    y = (jax.random.uniform(k_y, (n, 1)) > 0.5).astype(jnp.float32)       # labels

    obj = gdopt_forward(x, theta, s, y)
    jax.block_until_ready(obj)
    assert jnp.isfinite(obj)
    ref = _gdopt_reference(x, theta, s, y)
    assert jnp.allclose(obj, ref, rtol=5e-3, atol=1e-4), (obj, ref)

    # Exercise the multi-tile path (grid 3x3, padded n) at a larger n.
    n2 = 300
    x2 = jax.random.normal(k_x2, (n2, m), dtype=jnp.float32)
    s2 = (jax.random.uniform(k_s2, (n2, 1)) > 0.5).astype(jnp.float32)
    y2 = (jax.random.uniform(k_y2, (n2, 1)) > 0.5).astype(jnp.float32)
    obj2 = gdopt_forward(x2, theta, s2, y2)
    jax.block_until_ready(obj2)
    assert jnp.isfinite(obj2)
    ref2 = _gdopt_reference(x2, theta, s2, y2)
    assert jnp.allclose(obj2, ref2, rtol=1e-2, atol=1e-3), (obj2, ref2)

    print("KERNEL_OK")
</pallas_src>

<mosaic_0001>
module attributes {stable_mosaic.version = 11 : i64} {
  func.func @gdopt_kernel(%arg0: i32, %arg1: i32, %arg2: memref<128x8xf32, #tpu.memory_space<vmem>>, %arg3: memref<128x8xf32, #tpu.memory_space<vmem>>, %arg4: memref<128x1xf32, #tpu.memory_space<vmem>>, %arg5: memref<1x128xf32, #tpu.memory_space<vmem>>, %arg6: memref<128x128xf32, #tpu.memory_space<vmem>>, %arg7: memref<128x128xf32, #tpu.memory_space<vmem>>, %arg8: memref<1x1x128xf32, #tpu.memory_space<vmem>>, %arg9: memref<1x1x128xf32, #tpu.memory_space<vmem>>, %arg10: memref<1x1x128xf32, #tpu.memory_space<vmem>>, %arg11: memref<1x1x128xf32, #tpu.memory_space<vmem>>, %arg12: memref<1x1x128xf32, #tpu.memory_space<vmem>>, %arg13: memref<1x1xf32, #tpu.memory_space<vmem>>, %arg14: memref<1x1xf32, #tpu.memory_space<vmem>>, %arg15: memref<1x1xf32, #tpu.memory_space<vmem>>, %arg16: memref<128x1xf32, #tpu.memory_space<vmem>>) attributes {dimension_semantics = [#tpu.dimension_semantics<parallel>, #tpu.dimension_semantics<arbitrary>], iteration_bounds = array<i64: 1, 1>, scalar_prefetch = 0 : i64, scratch_operands = 4 : i64, tpu.core_type = #tpu.core_type<tc>, window_params = [{transform_indices = @transform_0, window_bounds = array<i64: 128, 8>}, {transform_indices = @transform_1, window_bounds = array<i64: 128, 8>}, {transform_indices = @transform_2, window_bounds = array<i64: 128, 1>}, {transform_indices = @transform_3, window_bounds = array<i64: 1, 128>}, {transform_indices = @transform_4, window_bounds = array<i64: 128, 128>}, {transform_indices = @transform_5, window_bounds = array<i64: 128, 128>}, {transform_indices = @transform_6, window_bounds = array<i64: 1, 1, 128>}, {transform_indices = @transform_7, window_bounds = array<i64: 1, 1, 128>}, {transform_indices = @transform_8, window_bounds = array<i64: 1, 1, 128>}, {transform_indices = @transform_9, window_bounds = array<i64: 1, 1, 128>}, {transform_indices = @transform_10, window_bounds = array<i64: 1, 1, 128>}]} {
    %c0_i32 = arith.constant 0 : i32
    %0 = arith.cmpi eq, %arg1, %c0_i32 : i32
    %1 = arith.extui %0 : i1 to i32
    %c0_i32_0 = arith.constant 0 : i32
    %2 = arith.cmpi ne, %1, %c0_i32_0 : i32
    scf.if %2 {
      %cst_37 = arith.constant 0.000000e+00 : f32
      %56 = vector.broadcast %cst_37 : f32 to vector<1x1xf32>
      %c0_38 = arith.constant 0 : index
      %c0_39 = arith.constant 0 : index
      %57 = vector.load %arg13[%c0_38, %c0_39] : memref<1x1xf32, #tpu.memory_space<vmem>>, vector<1x1xf32>
      tpu.vector_store %arg13[%c0_38, %c0_39], %56 {strides = array<i32>} : memref<1x1xf32, #tpu.memory_space<vmem>>, vector<1x1xf32>,
      %cst_40 = arith.constant 0.000000e+00 : f32
      %58 = vector.broadcast %cst_40 : f32 to vector<1x1xf32>
      %c0_41 = arith.constant 0 : index
      %c0_42 = arith.constant 0 : index
      %59 = vector.load %arg14[%c0_41, %c0_42] : memref<1x1xf32, #tpu.memory_space<vmem>>, vector<1x1xf32>
      tpu.vector_store %arg14[%c0_41, %c0_42], %58 {strides = array<i32>} : memref<1x1xf32, #tpu.memory_space<vmem>>, vector<1x1xf32>,
      %cst_43 = arith.constant 0.000000e+00 : f32
      %60 = vector.broadcast %cst_43 : f32 to vector<1x1xf32>
      %c0_44 = arith.constant 0 : index
      %c0_45 = arith.constant 0 : index
      %61 = vector.load %arg15[%c0_44, %c0_45] : memref<1x1xf32, #tpu.memory_space<vmem>>, vector<1x1xf32>
      tpu.vector_store %arg15[%c0_44, %c0_45], %60 {strides = array<i32>} : memref<1x1xf32, #tpu.memory_space<vmem>>, vector<1x1xf32>,
      %cst_46 = arith.constant 0.000000e+00 : f32
      %62 = vector.broadcast %cst_46 : f32 to vector<128x1xf32>
      %c0_47 = arith.constant 0 : index
      %c0_48 = arith.constant 0 : index
      %63 = vector.load %arg16[%c0_47, %c0_48] : memref<128x1xf32, #tpu.memory_space<vmem>>, vector<128x1xf32>
      tpu.vector_store %arg16[%c0_47, %c0_48], %62 {strides = array<i32>} : memref<128x1xf32, #tpu.memory_space<vmem>>, vector<128x1xf32>,
    } else {
    }
    %c0 = arith.constant 0 : index
    %c0_1 = arith.constant 0 : index
    %3 = vector.load %arg2[%c0, %c0_1] : memref<128x8xf32, #tpu.memory_space<vmem>>, vector<128x8xf32>
    %c0_2 = arith.constant 0 : index
    %c0_3 = arith.constant 0 : index
    %4 = vector.load %arg3[%c0_2, %c0_3] : memref<128x8xf32, #tpu.memory_space<vmem>>, vector<128x8xf32>
    %cst = arith.constant dense<0.000000e+00> : vector<128x128xf32>
    %5 = tpu.matmul %3, %4, %cst {dimension_numbers = #tpu.dot_dimension_numbers<[1], [1], [0], [0], [0, 0, 1, 0], [], []>} : vector<128x8xf32>, vector<128x8xf32>, vector<128x128xf32> -> vector<128x128xf32>
    %c0_4 = arith.constant 0 : index
    %c0_5 = arith.constant 0 : index
    %6 = vector.load %arg4[%c0_4, %c0_5] : memref<128x1xf32, #tpu.memory_space<vmem>>, vector<128x1xf32>
    %c0_6 = arith.constant 0 : index
    %c0_7 = arith.constant 0 : index
    %7 = vector.load %arg5[%c0_6, %c0_7] : memref<1x128xf32, #tpu.memory_space<vmem>>, vector<1x128xf32>
    %8 = vector.broadcast %6 : vector<128x1xf32> to vector<128x128xf32>
    %9 = vector.broadcast %7 : vector<1x128xf32> to vector<128x128xf32>
    %10 = arith.addf %8, %9 : vector<128x128xf32>
    %cst_8 = arith.constant 2.000000e+00 : f32
    %11 = vector.broadcast %cst_8 : f32 to vector<128x128xf32>
    %12 = arith.mulf %11, %5 : vector<128x128xf32>
    %13 = arith.subf %10, %12 : vector<128x128xf32>
    %cst_9 = arith.constant 0.000000e+00 : f32
    %14 = vector.broadcast %cst_9 : f32 to vector<128x128xf32>
    %15 = arith.maximumf %13, %14 : vector<128x128xf32>
    %cst_10 = arith.constant -5.000000e-01 : f32
    %16 = vector.broadcast %cst_10 : f32 to vector<128x128xf32>
    %17 = arith.mulf %15, %16 : vector<128x128xf32>
    %18 = math.exp %17 : vector<128x128xf32>
    %c0_11 = arith.constant 0 : index
    %c0_12 = arith.constant 0 : index
    %19 = vector.load %arg13[%c0_11, %c0_12] : memref<1x1xf32, #tpu.memory_space<vmem>>, vector<1x1xf32>
    %c0_13 = arith.constant 0 : index
    %c0_14 = arith.constant 0 : index
    %20 = vector.load %arg6[%c0_13, %c0_14] : memref<128x128xf32, #tpu.memory_space<vmem>>, vector<128x128xf32>
    %21 = arith.mulf %18, %20 : vector<128x128xf32>
    %22 = vector.shape_cast %21 : vector<128x128xf32> to vector<1x128x128xf32>
    %cst_15 = arith.constant dense<0.000000e+00> : vector<1xf32>
    %23 = vector.multi_reduction <add>, %22, %cst_15 [1, 2] : vector<1x128x128xf32> to vector<1xf32>
    %24 = vector.shape_cast %23 : vector<1xf32> to vector<1x1x1xf32>
    %25 = vector.extract %24[0, 0, 0] : f32 from vector<1x1x1xf32>
    %26 = vector.broadcast %25 : f32 to vector<1x1xf32>
    %27 = arith.addf %19, %26 : vector<1x1xf32>
    %c0_16 = arith.constant 0 : index
    %c0_17 = arith.constant 0 : index
    %28 = vector.load %arg13[%c0_16, %c0_17] : memref<1x1xf32, #tpu.memory_space<vmem>>, vector<1x1xf32>
    tpu.vector_store %arg13[%c0_16, %c0_17], %27 {strides = array<i32>} : memref<1x1xf32, #tpu.memory_space<vmem>>, vector<1x1xf32>,
    %c0_18 = arith.constant 0 : index
    %c0_19 = arith.constant 0 : index
    %29 = vector.load %arg14[%c0_18, %c0_19] : memref<1x1xf32, #tpu.memory_space<vmem>>, vector<1x1xf32>
    %c0_20 = arith.constant 0 : index
    %c0_21 = arith.constant 0 : index
    %30 = vector.load %arg7[%c0_20, %c0_21] : memref<128x128xf32, #tpu.memory_space<vmem>>, vector<128x128xf32>
    %31 = arith.mulf %18, %30 : vector<128x128xf32>
    %32 = vector.shape_cast %31 : vector<128x128xf32> to vector<1x128x128xf32>
    %cst_22 = arith.constant dense<0.000000e+00> : vector<1xf32>
    %33 = vector.multi_reduction <add>, %32, %cst_22 [1, 2] : vector<1x128x128xf32> to vector<1xf32>
    %34 = vector.shape_cast %33 : vector<1xf32> to vector<1x1x1xf32>
    %35 = vector.extract %34[0, 0, 0] : f32 from vector<1x1x1xf32>
    %36 = vector.broadcast %35 : f32 to vector<1x1xf32>
    %37 = arith.addf %29, %36 : vector<1x1xf32>
    %c0_23 = arith.constant 0 : index
    %c0_24 = arith.constant 0 : index
    %38 = vector.load %arg14[%c0_23, %c0_24] : memref<1x1xf32, #tpu.memory_space<vmem>>, vector<1x1xf32>
    tpu.vector_store %arg14[%c0_23, %c0_24], %37 {strides = array<i32>} : memref<1x1xf32, #tpu.memory_space<vmem>>, vector<1x1xf32>,
    %c0_25 = arith.constant 0 : index
    %c0_26 = arith.constant 0 : index
    %39 = vector.load %arg15[%c0_25, %c0_26] : memref<1x1xf32, #tpu.memory_space<vmem>>, vector<1x1xf32>
    %40 = arith.mulf %18, %18 : vector<128x128xf32>
    %41 = vector.shape_cast %40 : vector<128x128xf32> to vector<1x128x128xf32>
    %cst_27 = arith.constant dense<0.000000e+00> : vector<1xf32>
    %42 = vector.multi_reduction <add>, %41, %cst_27 [1, 2] : vector<1x128x128xf32> to vector<1xf32>
    %43 = vector.shape_cast %42 : vector<1xf32> to vector<1x1x1xf32>
    %44 = vector.extract %43[0, 0, 0] : f32 from vector<1x1x1xf32>
    %45 = vector.broadcast %44 : f32 to vector<1x1xf32>
    %46 = arith.addf %39, %45 : vector<1x1xf32>
    %c0_28 = arith.constant 0 : index
    %c0_29 = arith.constant 0 : index
    %47 = vector.load %arg15[%c0_28, %c0_29] : memref<1x1xf32, #tpu.memory_space<vmem>>, vector<1x1xf32>
    tpu.vector_store %arg15[%c0_28, %c0_29], %46 {strides = array<i32>} : memref<1x1xf32, #tpu.memory_space<vmem>>, vector<1x1xf32>,
    %c0_30 = arith.constant 0 : index
    %c0_31 = arith.constant 0 : index
    %48 = vector.load %arg16[%c0_30, %c0_31] : memref<128x1xf32, #tpu.memory_space<vmem>>, vector<128x1xf32>
    %cst_32 = arith.constant dense<0.000000e+00> : vector<128xf32>
    %49 = vector.multi_reduction <add>, %18, %cst_32 [1] : vector<128x128xf32> to vector<128xf32>
    %50 = vector.shape_cast %49 : vector<128xf32> to vector<128x1xf32>
    %51 = arith.addf %48, %50 : vector<128x1xf32>
    %c0_33 = arith.constant 0 : index
    %c0_34 = arith.constant 0 : index
    %52 = vector.load %arg16[%c0_33, %c0_34] : memref<128x1xf32, #tpu.memory_space<vmem>>, vector<128x1xf32>
    tpu.vector_store %arg16[%c0_33, %c0_34], %51 {strides = array<i32>} : memref<128x1xf32, #tpu.memory_space<vmem>>, vector<128x1xf32>,
    %c0_i32_35 = arith.constant 0 : i32
    %53 = arith.cmpi eq, %arg1, %c0_i32_35 : i32
    %54 = arith.extui %53 : i1 to i32
    %c0_i32_36 = arith.constant 0 : i32
    %55 = arith.cmpi ne, %54, %c0_i32_36 : i32
    scf.if %55 {
      %c0_37 = arith.constant 0 : index
      %c0_38 = arith.constant 0 : index
      %56 = vector.load %arg16[%c0_37, %c0_38] : memref<128x1xf32, #tpu.memory_space<vmem>>, vector<128x1xf32>
      %c0_39 = arith.constant 0 : index
      %c0_40 = arith.constant 0 : index
      %57 = vector.load %arg13[%c0_39, %c0_40] : memref<1x1xf32, #tpu.memory_space<vmem>>, vector<1x1xf32>
      %58 = vector.extract %57[0, 0] : f32 from vector<1x1xf32>
      %59 = vector.broadcast %58 : f32 to vector<1x1x128xf32>
      %c0_41 = arith.constant 0 : index
      %c0_42 = arith.constant 0 : index
      %c0_43 = arith.constant 0 : index
      %60 = vector.load %arg8[%c0_41, %c0_42, %c0_43] : memref<1x1x128xf32, #tpu.memory_space<vmem>>, vector<1x1x128xf32>
      tpu.vector_store %arg8[%c0_41, %c0_42, %c0_43], %59 {strides = array<i32>} : memref<1x1x128xf32, #tpu.memory_space<vmem>>, vector<1x1x128xf32>,
      %c0_44 = arith.constant 0 : index
      %c0_45 = arith.constant 0 : index
      %61 = vector.load %arg14[%c0_44, %c0_45] : memref<1x1xf32, #tpu.memory_space<vmem>>, vector<1x1xf32>
      %62 = vector.extract %61[0, 0] : f32 from vector<1x1xf32>
      %63 = vector.broadcast %62 : f32 to vector<1x1x128xf32>
      %c0_46 = arith.constant 0 : index
      %c0_47 = arith.constant 0 : index
      %c0_48 = arith.constant 0 : index
      %64 = vector.load %arg9[%c0_46, %c0_47, %c0_48] : memref<1x1x128xf32, #tpu.memory_space<vmem>>, vector<1x1x128xf32>
      tpu.vector_store %arg9[%c0_46, %c0_47, %c0_48], %63 {strides = array<i32>} : memref<1x1x128xf32, #tpu.memory_space<vmem>>, vector<1x1x128xf32>,
      %c0_49 = arith.constant 0 : index
      %c0_50 = arith.constant 0 : index
      %65 = vector.load %arg15[%c0_49, %c0_50] : memref<1x1xf32, #tpu.memory_space<vmem>>, vector<1x1xf32>
      %66 = vector.extract %65[0, 0] : f32 from vector<1x1xf32>
      %67 = vector.broadcast %66 : f32 to vector<1x1x128xf32>
      %c0_51 = arith.constant 0 : index
      %c0_52 = arith.constant 0 : index
      %c0_53 = arith.constant 0 : index
      %68 = vector.load %arg10[%c0_51, %c0_52, %c0_53] : memref<1x1x128xf32, #tpu.memory_space<vmem>>, vector<1x1x128xf32>
      tpu.vector_store %arg10[%c0_51, %c0_52, %c0_53], %67 {strides = array<i32>} : memref<1x1x128xf32, #tpu.memory_space<vmem>>, vector<1x1x128xf32>,
      %69 = arith.mulf %56, %56 : vector<128x1xf32>
      %70 = vector.shape_cast %69 : vector<128x1xf32> to vector<1x128x1xf32>
      %cst_54 = arith.constant dense<0.000000e+00> : vector<1xf32>
      %71 = vector.multi_reduction <add>, %70, %cst_54 [1, 2] : vector<1x128x1xf32> to vector<1xf32>
      %72 = vector.shape_cast %71 : vector<1xf32> to vector<1x1x1xf32>
      %73 = vector.extract %72[0, 0, 0] : f32 from vector<1x1x1xf32>
      %74 = vector.broadcast %73 : f32 to vector<1x1x128xf32>
      %c0_55 = arith.constant 0 : index
      %c0_56 = arith.constant 0 : index
      %c0_57 = arith.constant 0 : index
      %75 = vector.load %arg11[%c0_55, %c0_56, %c0_57] : memref<1x1x128xf32, #tpu.memory_space<vmem>>, vector<1x1x128xf32>
      tpu.vector_store %arg11[%c0_55, %c0_56, %c0_57], %74 {strides = array<i32>} : memref<1x1x128xf32, #tpu.memory_space<vmem>>, vector<1x1x128xf32>,
      %76 = vector.shape_cast %56 : vector<128x1xf32> to vector<1x128x1xf32>
      %cst_58 = arith.constant dense<0.000000e+00> : vector<1xf32>
      %77 = vector.multi_reduction <add>, %76, %cst_58 [1, 2] : vector<1x128x1xf32> to vector<1xf32>
      %78 = vector.shape_cast %77 : vector<1xf32> to vector<1x1x1xf32>
      %79 = vector.extract %78[0, 0, 0] : f32 from vector<1x1x1xf32>
      %80 = vector.broadcast %79 : f32 to vector<1x1x128xf32>
      %c0_59 = arith.constant 0 : index
      %c0_60 = arith.constant 0 : index
      %c0_61 = arith.constant 0 : index
      %81 = vector.load %arg12[%c0_59, %c0_60, %c0_61] : memref<1x1x128xf32, #tpu.memory_space<vmem>>, vector<1x1x128xf32>
      tpu.vector_store %arg12[%c0_59, %c0_60, %c0_61], %80 {strides = array<i32>} : memref<1x1x128xf32, #tpu.memory_space<vmem>>, vector<1x1x128xf32>,
    } else {
    }
    return
  }
  func.func @transform_0(%arg0: i32, %arg1: i32) -> (i32, i32) {
    %c0_i32 = arith.constant 0 : i32
    %c0_i32_0 = arith.constant 0 : i32
    return %arg0, %c0_i32 : i32, i32
  }
  func.func @transform_1(%arg0: i32, %arg1: i32) -> (i32, i32) {
    %c0_i32 = arith.constant 0 : i32
    %c0_i32_0 = arith.constant 0 : i32
    return %arg1, %c0_i32 : i32, i32
  }
  func.func @transform_2(%arg0: i32, %arg1: i32) -> (i32, i32) {
    %c0_i32 = arith.constant 0 : i32
    %c0_i32_0 = arith.constant 0 : i32
    return %arg0, %c0_i32 : i32, i32
  }
  func.func @transform_3(%arg0: i32, %arg1: i32) -> (i32, i32) {
    %c0_i32 = arith.constant 0 : i32
    %c0_i32_0 = arith.constant 0 : i32
    return %c0_i32, %arg1 : i32, i32
  }
  func.func @transform_4(%arg0: i32, %arg1: i32) -> (i32, i32) {
    %c0_i32 = arith.constant 0 : i32
    return %arg0, %arg1 : i32, i32
  }
  func.func @transform_5(%arg0: i32, %arg1: i32) -> (i32, i32) {
    %c0_i32 = arith.constant 0 : i32
    return %arg0, %arg1 : i32, i32
  }
  func.func @transform_6(%arg0: i32, %arg1: i32) -> (i32, i32, i32) {
    %c0_i32 = arith.constant 0 : i32
    %c0_i32_0 = arith.constant 0 : i32
    %c0_i32_1 = arith.constant 0 : i32
    return %arg0, %c0_i32, %c0_i32_0 : i32, i32, i32
  }
  func.func @transform_7(%arg0: i32, %arg1: i32) -> (i32, i32, i32) {
    %c0_i32 = arith.constant 0 : i32
    %c0_i32_0 = arith.constant 0 : i32
    %c0_i32_1 = arith.constant 0 : i32
    return %arg0, %c0_i32, %c0_i32_0 : i32, i32, i32
  }
  func.func @transform_8(%arg0: i32, %arg1: i32) -> (i32, i32, i32) {
    %c0_i32 = arith.constant 0 : i32
    %c0_i32_0 = arith.constant 0 : i32
    %c0_i32_1 = arith.constant 0 : i32
    return %arg0, %c0_i32, %c0_i32_0 : i32, i32, i32
  }
  func.func @transform_9(%arg0: i32, %arg1: i32) -> (i32, i32, i32) {
    %c0_i32 = arith.constant 0 : i32
    %c0_i32_0 = arith.constant 0 : i32
    %c0_i32_1 = arith.constant 0 : i32
    return %arg0, %c0_i32, %c0_i32_0 : i32, i32, i32
  }
  func.func @transform_10(%arg0: i32, %arg1: i32) -> (i32, i32, i32) {
    %c0_i32 = arith.constant 0 : i32
    %c0_i32_0 = arith.constant 0 : i32
    %c0_i32_1 = arith.constant 0 : i32
    return %arg0, %c0_i32, %c0_i32_0 : i32, i32, i32
  }
}

</mosaic_0001>

<bundles_post_ra>
// kernel: tpu_custom_call.1
= control target key start
LH: loop header
LB: loop body
LE: loop exit
PB: predicated region body
PF: predicated region fallthrough
CT: control target
= control target key end

     0   :  { %16 = vsyncpa [#allocation7], 0  ;;  %s1829_s0 = inlined_call_operand.vmem [shape: f32[128,8], index: 0, kind: input, shape index: {}]   ;;  %s1830_s1 = inlined_call_operand.vmem [shape: f32[128,8], index: 1, kind: input, shape index: {}]   ;;  %s1831_s2 = inlined_call_operand.vmem [shape: f32[128,1], index: 2, kind: input, shape index: {}]   ;;  %s1832_s3 = inlined_call_operand.vmem [shape: f32[1,128], index: 3, kind: input, shape index: {}]   ;;  %s1833_s4 = inlined_call_operand.vmem [shape: f32[128,128], index: 4, kind: input, shape index: {}]   ;;  %s1834_s5 = inlined_call_operand.vmem [shape: f32[128,128], index: 5, kind: input, shape index: {}]   ;;  %s1835_s6 = inlined_call_operand.hbm [shape: f32[1,1,128], index: 6, kind: output, shape index: {0}]   ;;  %s1836_s7 = inlined_call_operand.hbm [shape: f32[1,1,128], index: 7, kind: output, shape index: {1}]   ;;  %s1837_s8 = inlined_call_operand.hbm [shape: f32[1,1,128], index: 8, kind: output, shape index: {2}]   ;;  %s1838_s9 = inlined_call_operand.hbm [shape: f32[1,1,128], index: 9, kind: output, shape index: {3}]   ;;  %s1839_s10 = inlined_call_operand.hbm [shape: f32[1,1,128], index: 10, kind: output, shape index: {4}]  }
   0x1   :  { %17 = vsyncpa [#allocation9], 0  ;;  %v87_v0 = vld [vmem:[%s1830_s1 + $0x78] sm:$0xff]  ;;  %vm88_vm0 = vcmask 64512   ;;  %v86_v1 = vld [vmem:[%s1830_s1 + $0x70] sm:$0xff]  ;;  %v1306_v3 = vmov 0  }
   0x2   :  { %1055 = vmatprep.subr.msk.mxu0 %vm88_vm0, %v87_v0  ;;  %1111 = vmatprep.subr.msk.mxu1 %vm88_vm0, %v87_v0  ;;  %v85_v2 = vld [vmem:[%s1830_s1 + $0x68] sm:$0xff]  ;;  %v56_v4 = vld [vmem:[%s1829_s0] sm:$0xff]  ;;  %v332_v8 = vld [vmem:[%s1831_s2 + $0x10] sm:$0xff] }
   0x3   :  { %1056 = vmatpush3.xpose.msk.msra.mxu0 %vm88_vm0, %v87_v0  ;;  %1127 = vmatpush3.xpose.msk.msra.mxu1 %vm88_vm0, %v87_v0  ;;  %v64_v5 = vld [vmem:[%s1829_s0 + $0x40] sm:$0xff]  ;;  %v83_v9 = vld [vmem:[%s1830_s1 + $0x58] sm:$0xff]  ;;  %v331_v10 = vld [vmem:[%s1831_s2 + $0x8] sm:$0xff] }
   0x4   :  { %1057 = vmatprep.subr.msk.mxu0 %vm88_vm0, %v86_v1  ;;  %1112 = vmatprep.subr.msk.mxu1 %vm88_vm0, %v86_v1  ;;  %v84_v6 = vld [vmem:[%s1830_s1 + $0x60] sm:$0xff]  ;;  %v333_v11 = vld [vmem:[%s1831_s2 + $0x18] sm:$0xff]  ;;  %v82_v12 = vld [vmem:[%s1830_s1 + $0x50] sm:$0xff] }
   0x5   :  { %1166 = vset.pattern.permute.xlu0 %v1306_v3  ;;  %1167 = vset.pattern.permute.xlu1 %v1306_v3  ;;  %v330_v7 = vld [vmem:[%s1831_s2] sm:$0xff] }
   0x6   :  { %1087 = vmatprep.mubr.msk.f32.mxu0 %vm88_vm0, %v56_v4  ;;  %1099 = vmatprep.mubr.msk.f32.mxu1 %vm88_vm0, %v64_v5 }
   0x7   :  { %1058 = vmatpush3.xpose.msk.msra.mxu0 %vm88_vm0, %v86_v1  ;;  %1128 = vmatpush3.xpose.msk.msra.mxu1 %vm88_vm0, %v86_v1 }
   0x8   :  { %1059 = vmatprep.subr.msk.mxu0 %vm88_vm0, %v85_v2  ;;  %1113 = vmatprep.subr.msk.mxu1 %vm88_vm0, %v85_v2 }
   0x9   :  { %349 = vperm.xlu0 %1166, %v330_v7   ;;  %359 = vperm.xlu1 %1167, %v332_v8  }
   0xb   :  { %1060 = vmatpush3.xpose.msk.msra.mxu0 %vm88_vm0, %v85_v2  ;;  %1129 = vmatpush3.xpose.msk.msra.mxu1 %vm88_vm0, %v85_v2 }
   0xc   :  { %1061 = vmatprep.subr.msk.mxu0 %vm88_vm0, %v84_v6  ;;  %1114 = vmatprep.subr.msk.mxu1 %vm88_vm0, %v84_v6 }
   0xd   :  { %354 = vperm.xlu0 %1166, %v331_v10   ;;  %364 = vperm.xlu1 %1167, %v333_v11  }
   0xf   :  { %1062 = vmatpush3.xpose.msk.msra.mxu0 %vm88_vm0, %v84_v6  ;;  %1130 = vmatpush3.xpose.msk.msra.mxu1 %vm88_vm0, %v84_v6 }
  0x10   :  { %1063 = vmatprep.subr.msk.mxu0 %vm88_vm0, %v83_v9  ;;  %1115 = vmatprep.subr.msk.mxu1 %vm88_vm0, %v83_v9 }
  0x11   :  { %18 = vsyncpa [#allocation12], 0  ;;  %v334_v13 = vld [vmem:[%s1831_s2 + $0x20] sm:$0xff]  ;;  %v335_v14 = vld [vmem:[%s1831_s2 + $0x28] sm:$0xff]  ;;  %vm39_vm1 = vcmask 7168   ;;  %vm35_vm2 = vcmask 0  }
  0x12   :  { %v81_v15 = vld [vmem:[%s1830_s1 + $0x48] sm:$0xff]  ;;  %369 = vperm.xlu0 %1166, %v334_v13   ;;  %374 = vperm.xlu1 %1167, %v335_v14   ;;  %v336_v16 = vld [vmem:[%s1831_s2 + $0x30] sm:$0xff]  ;;  %v337_v17 = vld [vmem:[%s1831_s2 + $0x38] sm:$0xff]  ;;  %s1308_s21 = smov [#allocation6]   ;;  %s1309_s23 = smov [#allocation8]  }
  0x13   :  { %1064 = vmatpush3.xpose.msk.msra.mxu0 %vm88_vm0, %v83_v9  ;;  %1131 = vmatpush3.xpose.msk.msra.mxu1 %vm88_vm0, %v83_v9  ;;  %v80_v18 = vld [vmem:[%s1830_s1 + $0x40] sm:$0xff]  ;;  %v339_v20 = vld [vmem:[%s1831_s2 + $0x48] sm:$0xff]  ;;  %v79_v21 = vld [vmem:[%s1830_s1 + $0x38] sm:$0xff]  ;;  %s928_s22 = sshll.u32 %s1308_s21, 4  ;;  %s1310_s26 = smov [#allocation10]   ;;  %s929_s22 = int_to_ptr.vmem [resolvable:$true] %s928_s22 }
  0x14   :  { %1065 = vmatprep.subr.msk.mxu0 %vm88_vm0, %v82_v12  ;;  %1116 = vmatprep.subr.msk.mxu1 %vm88_vm0, %v82_v12  ;;  %v338_v19 = vld [vmem:[%s1831_s2 + $0x40] sm:$0xff]  ;;  %v340_v22 = vld [vmem:[%s1831_s2 + $0x50] sm:$0xff]  ;;  %v341_v23 = vld [vmem:[%s1831_s2 + $0x58] sm:$0xff]  ;;  %s1204_s27 = scalar_lea.vmem %s929_s22, 32  ;;  %p1205_p1 = scmp.lt.s32.totalorder %s929_s22, %s929_s22 }
  0x15   :  { %v78_v24 = vld [vmem:[%s1830_s1 + $0x30] sm:$0xff]  ;;  %v342_v25 = vld [vmem:[%s1831_s2 + $0x60] sm:$0xff]  ;;  %v343_v26 = vld [vmem:[%s1831_s2 + $0x68] sm:$0xff] }
  0x16   :  { %379 = vperm.xlu0 %1166, %v336_v16   ;;  %384 = vperm.xlu1 %1167, %v337_v17   ;;  %v77_v27 = vld [vmem:[%s1830_s1 + $0x28] sm:$0xff]  ;;  %v344_v28 = vld [vmem:[%s1831_s2 + $0x70] sm:$0xff]  ;;  %v345_v29 = vld [vmem:[%s1831_s2 + $0x78] sm:$0xff] }
  0x17   :  { %1066 = vmatpush3.xpose.msk.msra.mxu0 %vm88_vm0, %v82_v12  ;;  %1132 = vmatpush3.xpose.msk.msra.mxu1 %vm88_vm0, %v82_v12  ;;  %v76_v30 = vld [vmem:[%s1830_s1 + $0x20] sm:$0xff]  ;;  %v75_v31 = vld [vmem:[%s1830_s1 + $0x18] sm:$0xff]  ;;  %v74_v32 = vld [vmem:[%s1830_s1 + $0x10] sm:$0xff] }
  0x18   :  { %1067 = vmatprep.subr.msk.mxu0 %vm88_vm0, %v81_v15  ;;  %1117 = vmatprep.subr.msk.mxu1 %vm88_vm0, %v81_v15  ;;  %v73_v33 = vld [vmem:[%s1830_s1 + $0x8] sm:$0xff]  ;;  %v72_v34 = vld [vmem:[%s1830_s1] sm:$0xff]  ;;  %v58_v37 = vld [vmem:[%s1829_s0 + $0x10] sm:$0xff]  ;;  %s938_s1 = sshll.u32 %s1309_s23, 4  ;;  %s939_s1 = int_to_ptr.vmem [resolvable:$true] %s938_s1 }
  0x19   :  { %v57_v35 = vld [vmem:[%s1829_s0 + $0x8] sm:$0xff]  ;;  %v66_v38 = vld [vmem:[%s1829_s0 + $0x50] sm:$0xff]  ;;  %v59_v39 = vld [vmem:[%s1829_s0 + $0x18] sm:$0xff] }
  0x1a   :  { %389 = vperm.xlu0 %1166, %v338_v19   ;;  %394 = vperm.xlu1 %1167, %v339_v20   ;;  %v65_v36 = vld [vmem:[%s1829_s0 + $0x48] sm:$0xff]  ;;  %v67_v40 = vld [vmem:[%s1829_s0 + $0x58] sm:$0xff]  ;;  %v60_v41 = vld [vmem:[%s1829_s0 + $0x20] sm:$0xff] }
  0x1b   :  { %1068 = vmatpush3.xpose.msk.msra.mxu0 %vm88_vm0, %v81_v15  ;;  %1133 = vmatpush3.xpose.msk.msra.mxu1 %vm88_vm0, %v81_v15  ;;  %v68_v42 = vld [vmem:[%s1829_s0 + $0x60] sm:$0xff]  ;;  %v61_v43 = vld [vmem:[%s1829_s0 + $0x28] sm:$0xff]  ;;  %v62_v45 = vld [vmem:[%s1829_s0 + $0x30] sm:$0xff] }
  0x1c   :  { %1069 = vmatprep.subr.msk.mxu0 %vm88_vm0, %v80_v18  ;;  %1118 = vmatprep.subr.msk.mxu1 %vm88_vm0, %v80_v18  ;;  %v69_v44 = vld [vmem:[%s1829_s0 + $0x68] sm:$0xff]  ;;  %v70_v46 = vld [vmem:[%s1829_s0 + $0x70] sm:$0xff]  ;;  %v63_v47 = vld [vmem:[%s1829_s0 + $0x38] sm:$0xff] }
  0x1d   :  { %v71_v48 = vld [vmem:[%s1829_s0 + $0x78] sm:$0xff]  ;;  %v1599_v56 = vld [vmem:[%s1832_s3] ss:$0 sm:$0xff]  ;;  %s948_s0 = sshll.u32 %s1310_s26, 4  ;;  %s1200_s3 = scalar_lea.vmem %s929_s22, 16  ;;  %s949_s0 = int_to_ptr.vmem [resolvable:$true] %s948_s0 }
  0x1e   :  { %399 = vperm.xlu0 %1166, %v340_v22   ;;  %404 = vperm.xlu1 %1167, %v341_v23   ;;  %p1201_p0 = scmp.ne.s32.totalorder %s929_s22, %s1200_s3  ;;  %p1206_p2 = scmp.lt.s32.totalorder %s1204_s27, %s1200_s3 }
  0x1f   :  { %1070 = vmatpush3.xpose.msk.msra.mxu0 %vm88_vm0, %v80_v18  ;;  %1134 = vmatpush3.xpose.msk.msra.mxu1 %vm88_vm0, %v80_v18 }
  0x20   :  { %1071 = vmatprep.subr.msk.mxu0 %vm88_vm0, %v79_v21  ;;  %1119 = vmatprep.subr.msk.mxu1 %vm88_vm0, %v79_v21  ;;  %p1207_p3 = por %p1206_p2, %p1205_p1 }
  0x22   :  { %409 = vperm.xlu0 %1166, %v342_v25   ;;  %414 = vperm.xlu1 %1167, %v343_v26   ;;  %p1208_p4 = pnand %p1207_p3, %p1201_p0 }
  0x23   :  { %1072 = vmatpush3.xpose.msk.msra.mxu0 %vm88_vm0, %v79_v21  ;;  %1135 = vmatpush3.xpose.msk.msra.mxu1 %vm88_vm0, %v79_v21 }
  0x24   :  { %1073 = vmatprep.subr.msk.mxu0 %vm88_vm0, %v78_v24  ;;  %1120 = vmatprep.subr.msk.mxu1 %vm88_vm0, %v78_v24 }
  0x26   :  { %419 = vperm.xlu0 %1166, %v344_v28   ;;  %424 = vperm.xlu1 %1167, %v345_v29  }
  0x27   :  { %1074 = vmatpush3.xpose.msk.msra.mxu0 %vm88_vm0, %v78_v24  ;;  %1136 = vmatpush3.xpose.msk.msra.mxu1 %vm88_vm0, %v78_v24 }
  0x28   :  { %1075 = vmatprep.subr.msk.mxu0 %vm88_vm0, %v77_v27  ;;  %1121 = vmatprep.subr.msk.mxu1 %vm88_vm0, %v77_v27 }
  0x2b   :  { %1076 = vmatpush3.xpose.msk.msra.mxu0 %vm88_vm0, %v77_v27  ;;  %1137 = vmatpush3.xpose.msk.msra.mxu1 %vm88_vm0, %v77_v27 }
  0x2c   :  { %1077 = vmatprep.subr.msk.mxu0 %vm88_vm0, %v76_v30  ;;  %1122 = vmatprep.subr.msk.mxu1 %vm88_vm0, %v76_v30 }
  0x2f   :  { %1078 = vmatpush3.xpose.msk.msra.mxu0 %vm88_vm0, %v76_v30  ;;  %1138 = vmatpush3.xpose.msk.msra.mxu1 %vm88_vm0, %v76_v30 }
  0x30   :  { %1079 = vmatprep.subr.msk.mxu0 %vm88_vm0, %v75_v31  ;;  %1123 = vmatprep.subr.msk.mxu1 %vm88_vm0, %v75_v31 }
  0x33   :  { %1080 = vmatpush3.xpose.msk.msra.mxu0 %vm88_vm0, %v75_v31  ;;  %1139 = vmatpush3.xpose.msk.msra.mxu1 %vm88_vm0, %v75_v31 }
  0x34   :  { %1081 = vmatprep.subr.msk.mxu0 %vm88_vm0, %v74_v32  ;;  %1124 = vmatprep.subr.msk.mxu1 %vm88_vm0, %v74_v32 }
  0x37   :  { %1082 = vmatpush3.xpose.msk.msra.mxu0 %vm88_vm0, %v74_v32  ;;  %1140 = vmatpush3.xpose.msk.msra.mxu1 %vm88_vm0, %v74_v32 }
  0x38   :  { %1083 = vmatprep.subr.msk.mxu0 %vm88_vm0, %v73_v33  ;;  %1125 = vmatprep.subr.msk.mxu1 %vm88_vm0, %v73_v33 }
  0x3b   :  { %1084 = vmatpush3.xpose.msk.msra.mxu0 %vm88_vm0, %v73_v33  ;;  %1141 = vmatpush3.xpose.msk.msra.mxu1 %vm88_vm0, %v73_v33 }
  0x3c   :  { %1085 = vmatprep.subr.msk.mxu0 %vm88_vm0, %v72_v34  ;;  %1126 = vmatprep.subr.msk.mxu1 %vm88_vm0, %v72_v34 }
  0x3f   :  { %1086 = vmatpush3.xpose.msk.msra.mxu0 %vm88_vm0, %v72_v34  ;;  %1142 = vmatpush3.xpose.msk.msra.mxu1 %vm88_vm0, %v72_v34 }
  0x42   :  { %1088 = vmatmul.mubr.msk.f32.vlgmr.msra.gmra.mxu0 %vm88_vm0, %v57_v35  ;;  %1100 = vmatmul.mubr.msk.f32.vlgmr.msra.gmra.mxu1 %vm88_vm0, %v65_v36 }
  0x43   :  { %1090 = vmatprep.mubr.msk.f32.mxu0 %vm88_vm0, %v58_v37  ;;  %1102 = vmatprep.mubr.msk.f32.mxu1 %vm88_vm0, %v66_v38 }
  0x46   :  { %1091 = vmatmul.mubr.msk.f32.gmra.mxu0 %vm88_vm0, %v59_v39  ;;  %1103 = vmatmul.mubr.msk.f32.gmra.mxu1 %vm88_vm0, %v67_v40 }
  0x47   :  { %1093 = vmatprep.mubr.msk.f32.mxu0 %vm88_vm0, %v60_v41  ;;  %1105 = vmatprep.mubr.msk.f32.mxu1 %vm88_vm0, %v68_v42 }
  0x4a   :  { %1094 = vmatmul.mubr.msk.f32.gmra.mxu0 %vm88_vm0, %v61_v43  ;;  %1106 = vmatmul.mubr.msk.f32.gmra.mxu1 %vm88_vm0, %v69_v44 }
  0x4b   :  { %1096 = vmatprep.mubr.msk.f32.mxu0 %vm88_vm0, %v62_v45  ;;  %1108 = vmatprep.mubr.msk.f32.mxu1 %vm88_vm0, %v70_v46 }
  0x4e   :  { %1097 = vmatmul.mubr.msk.f32.gmra.mxu0 %vm88_vm0, %v63_v47  ;;  %1109 = vmatmul.mubr.msk.f32.gmra.mxu1 %vm88_vm0, %v71_v48 }
  0x84   :  { %v360_v49 = vpop.permute.xlu1 %359  ;;  %v350_v50 = vpop.permute.xlu0 %349 }
  0x85   :  { %v433_v62 = vadd.f32 %v1599_v56, %v350_v50  ;;  %v435_v13 = vadd.f32 %v1599_v56, %v360_v49 }
  0x88   :  { %v365_v51 = vpop.permute.xlu1 %364  ;;  %v355_v52 = vpop.permute.xlu0 %354 }
  0x89   :  { %v434_v58 = vadd.f32 %v1599_v56, %v355_v52  ;;  %v436_v7 = vadd.f32 %v1599_v56, %v365_v51 }
  0x8d   :  { %v375_v53 = vpop.permute.xlu1 %374  ;;  %v1592_v54 = vpop.permute.xlu0 %369 }
  0x8e   :  { %v438_v36 = vadd.f32 %v1599_v56, %v375_v53  ;;  %v437_v52 = vadd.f32 %v1599_v56, %v1592_v54 }
  0x91   :  { %v1594_v55 = vpop.permute.xlu1 %384  ;;  %v1601_v57 = vpop.permute.xlu0 %379 }
  0x92   :  { %v440_v53 = vadd.f32 %v1599_v56, %v1594_v55 }
  0x95   :  { %v395_v59 = vpop.permute.xlu1 %394  ;;  %v390_v4 = vpop.permute.xlu0 %389 }
  0x96   :  { %v442_v63 = vadd.f32 %v1599_v56, %v395_v59  ;;  %v441_v14 = vadd.f32 %v1599_v56, %v390_v4 }
  0x99   :  { %v405_v21 = vpop.permute.xlu1 %404  ;;  %v400_v25 = vpop.permute.xlu0 %399 }
  0x9a   :  { %v444_v26 = vadd.f32 %v1599_v56, %v405_v21 }
 0x102   :  { %v1089_v60 = vpop.f32.mrf.mxu0  ;;  %v1101_v61 = vpop.f32.mrf.mxu1 }
 0x103   :  { %v450_v0 = vmul.f32 2.0, %v1089_v60  ;;  %v458_v1 = vmul.f32 2.0, %v1101_v61  ;;  %v439_v61 = vadd.f32 %v1599_v56, %v1601_v57 }
 0x104   :  { %v251_v2 = vpop.f32.mrf.mxu0  ;;  %v291_v3 = vpop.f32.mrf.mxu1 }
 0x105   :  { %v466_v5 = vsub.f32 %v434_v58, %v450_v0  ;;  %v449_v6 = vmul.f32 2.0, %v251_v2  ;;  %v474_v11 = vsub.f32 %v442_v63, %v458_v1  ;;  %v457_v15 = vmul.f32 2.0, %v291_v3  ;;  %v410_v58 = vpop.permute.xlu0 %409  ;;  %v415_v0 = vpop.permute.xlu1 %414 }
 0x106   :  { %v1092_v8 = vpop.f32.mrf.mxu0  ;;  %v1104_v9 = vpop.f32.mrf.mxu1  ;;  %v446_v57 = vadd.f32 %v1599_v56, %v415_v0 }
 0x107   :  { %v482_v10 = vmax.f32 %v466_v5, 0.0  ;;  %v465_v12 = vsub.f32 %v433_v62, %v449_v6  ;;  %v452_v16 = vmul.f32 2.0, %v1092_v8  ;;  %v490_v28 = vmax.f32 %v474_v11, 0.0 }
 0x108   :  { %v261_v17 = vpop.f32.mrf.mxu0  ;;  %v301_v18 = vpop.f32.mrf.mxu1  ;;  %v473_v30 = vsub.f32 %v441_v14, %v457_v15  ;;  %v460_v32 = vmul.f32 2.0, %v1104_v9  ;;  %v443_v62 = vadd.f32 %v1599_v56, %v400_v25 }
 0x109   :  { %v498_v19 = vmul.f32 -0.5, %v482_v10  ;;  %v481_v20 = vmax.f32 %v465_v12, 0.0  ;;  %v468_v22 = vsub.f32 %v436_v7, %v452_v16  ;;  %v451_v23 = vmul.f32 2.0, %v261_v17 }
 0x10a   :  { %v1095_v24 = vpop.f32.mrf.mxu0  ;;  %v1107_v34 = vpop.f32.mrf.mxu1  ;;  %v506_v41 = vmul.f32 -0.5, %v490_v28  ;;  %v489_v44 = vmax.f32 %v473_v30, 0.0  ;;  %v476_v45 = vsub.f32 %v444_v26, %v460_v32  ;;  %v459_v49 = vmul.f32 2.0, %v301_v18  ;;  %v546_v30 = vld [vmem:[%s1833_s4] sm:$0xff] }
 0x10b   :  { %v515_v27 = vmul.f32 1.442695, %v498_v19  ;;  %v497_v29 = vmul.f32 -0.5, %v481_v20  ;;  %v484_v31 = vmax.f32 %v468_v22, 0.0  ;;  %v467_v33 = vsub.f32 %v435_v13, %v451_v23  ;;  %v420_v18 = vpop.permute.xlu0 %419  ;;  %v425_v20 = vpop.permute.xlu1 %424 }
 0x10c   :  { %v271_v35 = vpop.f32.mrf.mxu0  ;;  %v454_v38 = vmul.f32 2.0, %v1095_v24  ;;  %v311_v47 = vpop.f32.mrf.mxu1  ;;  %v531_v63 = vmul.f32 1.442695, %v506_v41  ;;  %v505_v3 = vmul.f32 -0.5, %v489_v44  ;;  %v492_v6 = vmax.f32 %v476_v45, 0.0 }
 0x10d   :  { %1168 = vpow2.f32 %v515_v27  ;;  %v513_v37 = vmul.f32 1.442695, %v497_v29  ;;  %v500_v39 = vmul.f32 -0.5, %v484_v31  ;;  %v483_v40 = vmax.f32 %v467_v33, 0.0  ;;  %v607_v31 = vld [vmem:[%s1834_s5] sm:$0xff] }
 0x10e   :  { %v470_v42 = vsub.f32 %v438_v36, %v454_v38  ;;  %v1098_v43 = vpop.f32.mrf.mxu0  ;;  %v453_v51 = vmul.f32 2.0, %v271_v35  ;;  %v1110_v54 = vpop.f32.mrf.mxu1  ;;  %v475_v55 = vsub.f32 %v443_v62, %v459_v49  ;;  %v462_v7 = vmul.f32 2.0, %v1107_v34  ;;  %v547_v36 = vld [vmem:[%s1833_s4 + $0x8] sm:$0xff]  ;;  %v609_v49 = vld [vmem:[%s1834_s5 + $0x10] sm:$0xff] }
 0x10f   :  { %1170 = vpow2.f32 %v513_v37  ;;  %v499_v46 = vmul.f32 -0.5, %v483_v40  ;;  %v519_v48 = vmul.f32 1.442695, %v500_v39  ;;  %v456_v60 = vmul.f32 2.0, %v1098_v43  ;;  %v608_v40 = vld [vmem:[%s1834_s5 + $0x8] sm:$0xff] }
 0x110   :  { %v486_v50 = vmax.f32 %v470_v42, 0.0  ;;  %v281_v2 = vpop.f32.mrf.mxu0  ;;  %v469_v4 = vsub.f32 %v437_v52, %v453_v51  ;;  %v461_v9 = vmul.f32 2.0, %v311_v47  ;;  %v445_v13 = vadd.f32 %v1599_v56, %v410_v58  ;;  %v321_v17 = vpop.f32.mrf.mxu1  ;;  %v548_v47 = vld [vmem:[%s1833_s4 + $0x10] sm:$0xff] }
 0x111   :  { %v517_v59 = vmul.f32 1.442695, %v499_v46  ;;  %v472_v5 = vsub.f32 %v440_v53, %v456_v60  ;;  %v455_v11 = vmul.f32 2.0, %v281_v2  ;;  %v529_v19 = vmul.f32 1.442695, %v505_v3  ;;  %v549_v3 = vld [vmem:[%s1833_s4 + $0x18] sm:$0xff] }
 0x112   :  { %v502_v1 = vmul.f32 -0.5, %v486_v50  ;;  %v485_v8 = vmax.f32 %v469_v4, 0.0  ;;  %v491_v21 = vmax.f32 %v475_v55, 0.0  ;;  %v478_v22 = vsub.f32 %v446_v57, %v462_v7  ;;  %v610_v4 = vld [vmem:[%s1834_s5 + $0x18] sm:$0xff] }
 0x113   :  { %1172 = vpow2.f32 %v517_v59  ;;  %v488_v10 = vmax.f32 %v472_v5, 0.0  ;;  %v471_v16 = vsub.f32 %v439_v61, %v455_v11  ;;  %v508_v24 = vmul.f32 -0.5, %v492_v6 }
 0x114   :  { %1174 = vpow2.f32 %v519_v48  ;;  %v523_v12 = vmul.f32 1.442695, %v502_v1  ;;  %v501_v14 = vmul.f32 -0.5, %v485_v8  ;;  %v477_v26 = vsub.f32 %v445_v13, %v461_v9  ;;  %v550_v8 = vld [vmem:[%s1833_s4 + $0x20] sm:$0xff] }
 0x115   :  { %v504_v15 = vmul.f32 -0.5, %v488_v10  ;;  %1176 = vpow2.f32 %v531_v63  ;;  %v464_v27 = vmul.f32 2.0, %v1110_v54  ;;  %v487_v28 = vmax.f32 %v471_v16, 0.0 }
 0x116   :  { %v521_v25 = vmul.f32 1.442695, %v501_v14  ;;  %1178 = vpow2.f32 %v523_v12  ;;  %v463_v29 = vmul.f32 2.0, %v321_v17  ;;  %v447_v33 = vadd.f32 %v1599_v56, %v420_v18 }
 0x117   :  { %v448_v34 = vadd.f32 %v1599_v56, %v425_v20  ;;  %v527_v35 = vmul.f32 1.442695, %v504_v15  ;;  %v507_v37 = vmul.f32 -0.5, %v491_v21  ;;  %v494_v38 = vmax.f32 %v478_v22, 0.0  ;;  %v611_v15 = vld [vmem:[%s1834_s5 + $0x20] sm:$0xff]  ;;  %v551_v21 = vld [vmem:[%s1833_s4 + $0x28] sm:$0xff] }
 0x118   :  { %1180 = vpow2.f32 %v521_v25  ;;  %v503_v39 = vmul.f32 -0.5, %v487_v28  ;;  %v535_v41 = vmul.f32 1.442695, %v508_v24  ;;  %v493_v42 = vmax.f32 %v477_v26, 0.0  ;;  %v612_v22 = vld [vmem:[%s1834_s5 + $0x28] sm:$0xff] }
 0x119   :  { %1182 = vpow2.f32 %v529_v19  ;;  %v480_v56 = vsub.f32 %v448_v34, %v464_v27  ;;  %v479_v46 = vsub.f32 %v447_v33, %v463_v29  ;;  %v533_v52 = vmul.f32 1.442695, %v507_v37 }
 0x11a   :  { %v1169_v23 = vpop.eup %1168  ;;  %v525_v45 = vmul.f32 1.442695, %v503_v39  ;;  %1184 = vpow2.f32 %v527_v35  ;;  %v510_v53 = vmul.f32 -0.5, %v494_v38  ;;  %v509_v0 = vmul.f32 -0.5, %v493_v42  ;;  %v613_v35 = vld [vmem:[%s1834_s5 + $0x30] sm:$0xff]  ;;  %v614_v42 = vld [vmem:[%s1834_s5 + $0x38] sm:$0xff] }
 0x11b   :  { %728 = vadd.xlane.f32.xlu1 %v1169_v23  ;;  %v563_v48 = vmul.f32 %v1169_v23, %v547_v36  ;;  %v624_v50 = vmul.f32 %v1169_v23, %v608_v40  ;;  %v496_v1 = vmax.f32 %v480_v56, 0.0  ;;  %v495_v2 = vmax.f32 %v479_v46, 0.0  ;;  %v553_v40 = vld [vmem:[%s1833_s4 + $0x38] sm:$0xff] }
 0x11c   :  { %v1171_v32 = vpop.eup %1170  ;;  %1186 = vpow2.f32 %v525_v45  ;;  %v668_v6 = vmul.f32 %v1169_v23, %v1169_v23  ;;  %v539_v7 = vmul.f32 1.442695, %v510_v53  ;;  %v537_v12 = vmul.f32 1.442695, %v509_v0 }
 0x11d   :  { %726 = vadd.xlane.f32.xlu0 %v1171_v32  ;;  %v562_v43 = vmul.f32 %v1171_v32, %v546_v30  ;;  %v623_v44 = vmul.f32 %v1171_v32, %v607_v31  ;;  %v667_v63 = vmul.f32 %v1171_v32, %v1171_v32  ;;  %1188 = vpow2.f32 %v535_v41  ;;  %v552_v32 = vld [vmem:[%s1833_s4 + $0x30] sm:$0xff] }
 0x11e   :  { %1190 = vpow2.f32 %v533_v52  ;;  %v512_v13 = vmul.f32 -0.5, %v496_v1  ;;  %v511_v14 = vmul.f32 -0.5, %v495_v2  ;;  %v1307_v24 = vmov 0.0  }
 0x11f   :  { %v578_v58 = vadd.f32 %v563_v48, %v562_v43  ;;  %v639_v62 = vadd.f32 %v624_v50, %v623_v44  ;;  %v683_v11 = vadd.f32 %v668_v6, %v667_v63  ;;  %41 = vst.msk [vmem:[#allocation5 + $0x8] sm:$0xff] %vm39_vm1, %v1307_v24  ;;  %40 = vst.msk [vmem:[#allocation5] sm:$0xff] %vm39_vm1, %v1307_v24  ;;  %1192 = vpow2.f32 %v539_v7  ;;  %v615_v50 = vld [vmem:[%s1834_s5 + $0x40] sm:$0xff] }
 0x120   :  { %v1173_v51 = vpop.eup %1172  ;;  %42 = vst.msk [vmem:[#allocation5 + $0x10] sm:$0xff] %vm39_vm1, %v1307_v24  ;;  %43 = vst.msk [vmem:[#allocation5 + $0x18] sm:$0xff] %vm39_vm1, %v1307_v24  ;;  %1194 = vpow2.f32 %v537_v12  ;;  %v543_v29 = vmul.f32 1.442695, %v512_v13  ;;  %v541_v30 = vmul.f32 1.442695, %v511_v14 }
 0x121   :  { %v1175_v59 = vpop.eup %1174  ;;  %730 = vadd.xlane.f32.xlu0 %v1173_v51  ;;  %v564_v60 = vmul.f32 %v1173_v51, %v548_v47  ;;  %v625_v61 = vmul.f32 %v1173_v51, %v609_v49  ;;  %v669_v55 = vmul.f32 %v1173_v51, %v1173_v51  ;;  %44 = vst.msk [vmem:[#allocation5 + $0x20] sm:$0xff] %vm39_vm1, %v1307_v24  ;;  %45 = vst.msk [vmem:[#allocation5 + $0x28] sm:$0xff] %vm39_vm1, %v1307_v24  ;;  %v554_v49 = vld [vmem:[%s1833_s4 + $0x40] sm:$0xff]  ;;  %v618_v12 = vld [vmem:[%s1834_s5 + $0x58] sm:$0xff] }
 0x122   :  { %v565_v9 = vmul.f32 %v1175_v59, %v549_v3  ;;  %v626_v10 = vmul.f32 %v1175_v59, %v610_v4  ;;  %v1649_v57 = vpop.eup %1176  ;;  %v670_v23 = vmul.f32 %v1175_v59, %v1175_v59  ;;  %46 = vst.msk [vmem:[#allocation5 + $0x30] sm:$0xff] %vm39_vm1, %v1307_v24  ;;  %47 = vst.msk [vmem:[#allocation5 + $0x38] sm:$0xff] %vm39_vm1, %v1307_v24  ;;  %1196 = vpow2.f32 %v541_v30  ;;  %v620_v30 = vld [vmem:[%s1834_s5 + $0x68] sm:$0xff] }
 0x123   :  { %v579_v5 = vadd.f32 %v578_v58, %v564_v60  ;;  %v640_v54 = vadd.f32 %v639_v62, %v625_v61  ;;  %v1179_v16 = vpop.eup %1178  ;;  %v684_v19 = vadd.f32 %v683_v11, %v669_v55  ;;  %48 = vst.msk [vmem:[#allocation5 + $0x40] sm:$0xff] %vm39_vm1, %v1307_v24  ;;  %49 = vst.msk [vmem:[#allocation5 + $0x48] sm:$0xff] %vm39_vm1, %v1307_v24  ;;  %1198 = vpow2.f32 %v543_v29  ;;  %v555_v61 = vld [vmem:[%s1833_s4 + $0x48] sm:$0xff]  ;;  %v557_v11 = vld [vmem:[%s1833_s4 + $0x58] sm:$0xff] }
 0x124   :  { %50 = vst.msk [vmem:[#allocation5 + $0x50] sm:$0xff] %vm39_vm1, %v1307_v24  ;;  %51 = vst.msk [vmem:[#allocation5 + $0x58] sm:$0xff] %vm39_vm1, %v1307_v24  ;;  %v567_v33 = vmul.f32 %v1179_v16, %v551_v21  ;;  %v628_v36 = vmul.f32 %v1179_v16, %v612_v22  ;;  %v672_v44 = vmul.f32 %v1179_v16, %v1179_v16  ;;  %v616_v62 = vld [vmem:[%s1834_s5 + $0x48] sm:$0xff]  ;;  %v558_v21 = vld [vmem:[%s1833_s4 + $0x60] sm:$0xff] }
 0x125   :  { %732 = vadd.xlane.f32.xlu0 %v1175_v59  ;;  %v580_v17 = vadd.f32 %v579_v5, %v565_v9  ;;  %v641_v18 = vadd.f32 %v640_v54, %v626_v10  ;;  %v1181_v20 = vpop.eup %1180  ;;  %52 = vst.msk [vmem:[#allocation5 + $0x60] sm:$0xff] %vm39_vm1, %v1307_v24  ;;  %53 = vst.msk [vmem:[#allocation5 + $0x68] sm:$0xff] %vm39_vm1, %v1307_v24  ;;  %v685_v31 = vadd.f32 %v684_v19, %v670_v23  ;;  %v556_v5 = vld [vmem:[%s1833_s4 + $0x50] sm:$0xff]  ;;  %v619_v22 = vld [vmem:[%s1834_s5 + $0x60] sm:$0xff] }
 0x126   :  { %54 = vst.msk [vmem:[#allocation5 + $0x70] sm:$0xff] %vm39_vm1, %v1307_v24  ;;  %55 = vst.msk [vmem:[#allocation5 + $0x78] sm:$0xff] %vm39_vm1, %v1307_v24  ;;  %v1183_v25 = vpop.eup %1182  ;;  %734 = vadd.xlane.f32.xlu1 %v1181_v20  ;;  %v566_v26 = vmul.f32 %v1181_v20, %v550_v8  ;;  %v627_v27 = vmul.f32 %v1181_v20, %v611_v15  ;;  %v671_v28 = vmul.f32 %v1181_v20, %v1181_v20  ;;  %v617_v54 = vld [vmem:[%s1834_s5 + $0x50] sm:$0xff]  ;;  %v559_v29 = vld [vmem:[%s1833_s4 + $0x68] sm:$0xff] }
 0x127   :  { %v1185_v38 = vpop.eup %1184  ;;  %v570_v1 = vmul.f32 %v1183_v25, %v554_v49  ;;  %v631_v3 = vmul.f32 %v1183_v25, %v615_v50  ;;  %v675_v6 = vmul.f32 %v1183_v25, %v1183_v25  ;;  %v571_v7 = vmul.f32 %v1649_v57, %v555_v61  ;;  %36 = vst.msk [vmem:[#allocation2] sm:$0x1] %vm35_vm2, %v1307_v24 }
 0x128   :  { %v581_v34 = vadd.f32 %v580_v17, %v566_v26  ;;  %v642_v37 = vadd.f32 %v641_v18, %v627_v27  ;;  %v686_v56 = vadd.f32 %v685_v31, %v671_v28  ;;  %v569_v52 = vmul.f32 %v1185_v38, %v553_v40  ;;  %37 = vst.msk [vmem:[#allocation3] sm:$0x1] %vm35_vm2, %v1307_v24 }
 0x129   :  { %736 = vadd.xlane.f32.xlu0 %v1179_v16  ;;  %v1187_v39 = vpop.eup %1186  ;;  %v630_v58 = vmul.f32 %v1185_v38, %v614_v42  ;;  %v674_v63 = vmul.f32 %v1185_v38, %v1185_v38  ;;  %v632_v9 = vmul.f32 %v1649_v57, %v616_v62  ;;  %v676_v13 = vmul.f32 %v1649_v57, %v1649_v57 }
 0x12a   :  { %v582_v41 = vadd.f32 %v581_v34, %v567_v33  ;;  %v643_v43 = vadd.f32 %v642_v37, %v628_v36  ;;  %738 = vadd.xlane.f32.xlu1 %v1187_v39  ;;  %v568_v45 = vmul.f32 %v1187_v39, %v552_v32  ;;  %v629_v46 = vmul.f32 %v1187_v39, %v613_v35  ;;  %v1189_v48 = vpop.eup %1188 }
 0x12b   :  { %v673_v47 = vmul.f32 %v1187_v39, %v1187_v39  ;;  %v687_v51 = vadd.f32 %v686_v56, %v672_v44  ;;  %v1191_v60 = vpop.eup %1190  ;;  %v573_v26 = vmul.f32 %v1189_v48, %v557_v11  ;;  %v634_v27 = vmul.f32 %v1189_v48, %v618_v12  ;;  %v621_v39 = vld [vmem:[%s1834_s5 + $0x70] sm:$0xff]  ;;  %38 = vst.msk [vmem:[#allocation4] sm:$0x1] %vm35_vm2, %v1307_v24  ;;  %v713_v12 = vld [vmem:[#allocation5 + $0x18] sm:$0xff]  ;;  %v714_v24 = vld [vmem:[#allocation5 + $0x20] sm:$0xff] }
 0x12c   :  { %v583_v53 = vadd.f32 %v582_v41, %v568_v45  ;;  %v644_v59 = vadd.f32 %v643_v43, %v629_v46  ;;  %v1193_v15 = vpop.eup %1192  ;;  %v572_v16 = vmul.f32 %v1191_v60, %v556_v5  ;;  %v633_v18 = vmul.f32 %v1191_v60, %v617_v54  ;;  %v561_v43 = vld [vmem:[%s1833_s4 + $0x78] sm:$0xff]  ;;  %v711_v5 = vld [vmem:[#allocation5 + $0x8] sm:$0xff] }
 0x12d   :  { %740 = vadd.xlane.f32.xlu0 %v1185_v38  ;;  %v688_v0 = vadd.f32 %v687_v51, %v673_v47  ;;  %v1195_v20 = vpop.eup %1194  ;;  %v677_v23 = vmul.f32 %v1191_v60, %v1191_v60  ;;  %v678_v31 = vmul.f32 %v1189_v48, %v1189_v48  ;;  %v560_v38 = vld [vmem:[%s1833_s4 + $0x70] sm:$0xff]  ;;  %v575_v44 = vmul.f32 %v1193_v15, %v559_v29  ;;  %v622_v47 = vld [vmem:[%s1834_s5 + $0x78] sm:$0xff] }
 0x12e   :  { %742 = vadd.xlane.f32.xlu1 %v1183_v25  ;;  %v584_v2 = vadd.f32 %v583_v53, %v569_v52  ;;  %v645_v4 = vadd.f32 %v644_v59, %v630_v58  ;;  %v574_v33 = vmul.f32 %v1195_v20, %v558_v21  ;;  %v635_v35 = vmul.f32 %v1195_v20, %v619_v22 }
 0x12f   :  { %v689_v55 = vadd.f32 %v688_v0, %v674_v63  ;;  %v1197_v37 = vpop.eup %1196  ;;  %v679_v40 = vmul.f32 %v1195_v20, %v1195_v20  ;;  %v636_v45 = vmul.f32 %v1193_v15, %v620_v30 }
 0x130   :  { %v585_v8 = vadd.f32 %v584_v2, %v570_v1  ;;  %v646_v10 = vadd.f32 %v645_v4, %v631_v3  ;;  %v1199_v42 = vpop.eup %1198  ;;  %v576_v50 = vmul.f32 %v1197_v37, %v560_v38  ;;  %v637_v52 = vmul.f32 %v1197_v37, %v621_v39  ;;  %v719_v39 = vld [vmem:[#allocation5 + $0x48] sm:$0xff] }
 0x131   :  { %744 = vadd.xlane.f32.xlu0 %v1649_v57  ;;  %v690_v14 = vadd.f32 %v689_v55, %v675_v6  ;;  %v577_v58 = vmul.f32 %v1199_v42, %v561_v43  ;;  %v638_v61 = vmul.f32 %v1199_v42, %v622_v47  ;;  %v681_v63 = vmul.f32 %v1197_v37, %v1197_v37  ;;  %v710_v6 = vld [vmem:[#allocation5] sm:$0xff] }
 0x132   :  { %746 = vadd.xlane.f32.xlu1 %v1191_v60  ;;  %v586_v17 = vadd.f32 %v585_v8, %v571_v7  ;;  %v647_v19 = vadd.f32 %v646_v10, %v632_v9  ;;  %v682_v3 = vmul.f32 %v1199_v42, %v1199_v42  ;;  %v712_v9 = vld [vmem:[#allocation5 + $0x10] sm:$0xff]  ;;  %v718_v43 = vld [vmem:[#allocation5 + $0x40] sm:$0xff] }
 0x133   :  { %v691_v25 = vadd.f32 %v690_v14, %v676_v13 }
 0x134   :  { %v587_v57 = vadd.f32 %v586_v17, %v572_v16  ;;  %v648_v28 = vadd.f32 %v647_v19, %v633_v18  ;;  %v715_v16 = vld [vmem:[#allocation5 + $0x28] sm:$0xff] }
 0x135   :  { %748 = vadd.xlane.f32.xlu0 %v1189_v48  ;;  %v692_v32 = vadd.f32 %v691_v25, %v677_v23  ;;  %v680_v48 = vmul.f32 %v1193_v15, %v1193_v15 }
 0x136   :  { %750 = vadd.xlane.f32.xlu1 %v1195_v20  ;;  %v588_v34 = vadd.f32 %v587_v57, %v573_v26  ;;  %v649_v36 = vadd.f32 %v648_v28, %v634_v27  ;;  %v717_v26 = vld [vmem:[#allocation5 + $0x38] sm:$0xff]  ;;  %v716_v27 = vld [vmem:[#allocation5 + $0x30] sm:$0xff] }
 0x137   :  { %v693_v41 = vadd.f32 %v692_v32, %v678_v31 }
 0x138   :  { %v589_v56 = vadd.f32 %v588_v34, %v574_v33  ;;  %v650_v46 = vadd.f32 %v649_v36, %v635_v35 }
 0x139   :  { %752 = vadd.xlane.f32.xlu0 %v1193_v15  ;;  %v694_v49 = vadd.f32 %v693_v41, %v679_v40 }
 0x13a   :  { %754 = vadd.xlane.f32.xlu1 %v1197_v37  ;;  %v590_v51 = vadd.f32 %v589_v56, %v575_v44  ;;  %v651_v53 = vadd.f32 %v650_v46, %v636_v45 }
 0x13b   :  { %v695_v59 = vadd.f32 %v694_v49, %v680_v48 }
 0x13c   :  { %v591_v60 = vadd.f32 %v590_v51, %v576_v50  ;;  %v652_v62 = vadd.f32 %v651_v53, %v637_v52  ;;  %v721_v52 = vld [vmem:[#allocation5 + $0x58] sm:$0xff] }
 0x13d   :  { %756 = vadd.xlane.f32.xlu0 %v1199_v42  ;;  %v696_v2 = vadd.f32 %v695_v59, %v681_v63 }
 0x13e   :  { %v592_v0 = vadd.f32 %v591_v60, %v577_v58  ;;  %v653_v1 = vadd.f32 %v652_v62, %v638_v61  ;;  %v720_v60 = vld [vmem:[#allocation5 + $0x50] sm:$0xff] }
 0x13f   :  { %v697_v4 = vadd.f32 %v696_v2, %v682_v3 }
 0x140   :  { %593 = vadd.xlane.f32.xlu1 %v592_v0 }
 0x141   :  { %654 = vadd.xlane.f32.xlu0 %v653_v1 }
 0x144   :  { %698 = vadd.xlane.f32.xlu1 %v697_v4 }
 0x1a4   :  { %v729_v54 = vpop.xlane.xlu1 %728 }
 0x1a5   :  { %v759_v55 = vadd.f32 %v729_v54, %v711_v5 }
 0x1a6   :  { %v727_v7 = vpop.xlane.xlu0 %726 }
 0x1a7   :  { %776 = vst.msk [vmem:[#allocation5 + $0x8] sm:$0xff] %vm39_vm1, %v759_v55  ;;  %v758_v8 = vadd.f32 %v727_v7, %v710_v6  ;;  %v723_v55 = vld [vmem:[#allocation5 + $0x68] sm:$0xff] }
 0x1a9   :  { %775 = vst.msk [vmem:[#allocation5] sm:$0xff] %vm39_vm1, %v758_v8 }
 0x1aa   :  { %v731_v10 = vpop.xlane.xlu0 %730 }
 0x1ab   :  { %v760_v11 = vadd.f32 %v731_v10, %v712_v9  ;;  %v722_v10 = vld [vmem:[#allocation5 + $0x60] sm:$0xff] }
 0x1ad   :  { %777 = vst.msk [vmem:[#allocation5 + $0x10] sm:$0xff] %vm39_vm1, %v760_v11 }
 0x1ae   :  { %v733_v13 = vpop.xlane.xlu0 %732  ;;  %v795_v17 = vld [vmem:[#allocation5 + $0x8] sm:$0xff] }
 0x1af   :  { %v761_v14 = vadd.f32 %v733_v13, %v713_v12  ;;  %v735_v19 = vpop.xlane.xlu1 %734  ;;  %v823_v25 = vmul.f32 %v795_v17, %v795_v17  ;;  %v881_v28 = vsel %vm39_vm1, %v795_v17, 0.0 }
 0x1b0   :  { %v794_v15 = vld [vmem:[#allocation5] sm:$0xff]  ;;  %v762_v21 = vadd.f32 %v735_v19, %v714_v24 }
 0x1b1   :  { %778 = vst.msk [vmem:[#allocation5 + $0x18] sm:$0xff] %vm39_vm1, %v761_v14  ;;  %v822_v18 = vmul.f32 %v794_v15, %v794_v15  ;;  %v880_v23 = vsel %vm39_vm1, %v794_v15, 0.0  ;;  %v839_v36 = vsel %vm39_vm1, %v823_v25, 0.0 }
 0x1b2   :  { %v737_v20 = vpop.xlane.xlu0 %736  ;;  %779 = vst.msk [vmem:[#allocation5 + $0x20] sm:$0xff] %vm39_vm1, %v762_v21  ;;  %v882_v33 = vadd.f32 %v881_v28, %v880_v23  ;;  %v725_v21 = vld [vmem:[#allocation5 + $0x78] sm:$0xff] }
 0x1b3   :  { %v763_v22 = vadd.f32 %v737_v20, %v715_v16  ;;  %v838_v31 = vsel %vm39_vm1, %v822_v18, 0.0  ;;  %v739_v34 = vpop.xlane.xlu1 %738 }
 0x1b4   :  { %v796_v57 = vld [vmem:[#allocation5 + $0x10] sm:$0xff]  ;;  %v764_v38 = vadd.f32 %v739_v34, %v716_v27  ;;  %v840_v42 = vadd.f32 %v839_v36, %v838_v31 }
 0x1b5   :  { %780 = vst.msk [vmem:[#allocation5 + $0x28] sm:$0xff] %vm39_vm1, %v763_v22  ;;  %v883_v29 = vsel %vm39_vm1, %v796_v57, 0.0  ;;  %v824_v30 = vmul.f32 %v796_v57, %v796_v57 }
 0x1b6   :  { %v741_v32 = vpop.xlane.xlu0 %740  ;;  %v884_v41 = vadd.f32 %v883_v29, %v882_v33  ;;  %781 = vst.msk [vmem:[#allocation5 + $0x30] sm:$0xff] %vm39_vm1, %v764_v38 }
 0x1b7   :  { %v765_v35 = vadd.f32 %v741_v32, %v717_v26  ;;  %v841_v37 = vsel %vm39_vm1, %v824_v30, 0.0  ;;  %v743_v48 = vpop.xlane.xlu1 %742  ;;  %v724_v26 = vld [vmem:[#allocation5 + $0x70] sm:$0xff] }
 0x1b8   :  { %v797_v40 = vld [vmem:[#allocation5 + $0x18] sm:$0xff]  ;;  %v842_v47 = vadd.f32 %v841_v37, %v840_v42  ;;  %v766_v51 = vadd.f32 %v743_v48, %v718_v43 }
 0x1b9   :  { %782 = vst.msk [vmem:[#allocation5 + $0x38] sm:$0xff] %vm39_vm1, %v765_v35  ;;  %v885_v44 = vsel %vm39_vm1, %v797_v40, 0.0  ;;  %v825_v56 = vmul.f32 %v797_v40, %v797_v40  ;;  %v798_v53 = vld [vmem:[#allocation5 + $0x20] sm:$0xff] }
 0x1ba   :  { %v745_v45 = vpop.xlane.xlu0 %744  ;;  %v886_v46 = vadd.f32 %v885_v44, %v884_v41  ;;  %v887_v61 = vsel %vm39_vm1, %v798_v53, 0.0  ;;  %v826_v63 = vmul.f32 %v798_v53, %v798_v53  ;;  %783 = vst.msk [vmem:[#allocation5 + $0x40] sm:$0xff] %vm39_vm1, %v766_v51 }
 0x1bb   :  { %v767_v49 = vadd.f32 %v745_v45, %v719_v39  ;;  %v843_v50 = vsel %vm39_vm1, %v825_v56, 0.0  ;;  %v747_v3 = vpop.xlane.xlu1 %746 }
 0x1bc   :  { %v799_v58 = vld [vmem:[#allocation5 + $0x28] sm:$0xff]  ;;  %v844_v59 = vadd.f32 %v843_v50, %v842_v47  ;;  %v888_v2 = vadd.f32 %v887_v61, %v886_v46  ;;  %v845_v5 = vsel %vm39_vm1, %v826_v63, 0.0  ;;  %v768_v6 = vadd.f32 %v747_v3, %v720_v60 }
 0x1bd   :  { %784 = vst.msk [vmem:[#allocation5 + $0x48] sm:$0xff] %vm39_vm1, %v767_v49  ;;  %v889_v62 = vsel %vm39_vm1, %v799_v58, 0.0  ;;  %v827_v0 = vmul.f32 %v799_v58, %v799_v58  ;;  %v800_v11 = vld [vmem:[#allocation5 + $0x30] sm:$0xff] }
 0x1be   :  { %v749_v1 = vpop.xlane.xlu0 %748  ;;  %v890_v8 = vadd.f32 %v889_v62, %v888_v2  ;;  %v846_v9 = vadd.f32 %v845_v5, %v844_v59  ;;  %785 = vst.msk [vmem:[#allocation5 + $0x50] sm:$0xff] %vm39_vm1, %v768_v6  ;;  %v891_v14 = vsel %vm39_vm1, %v800_v11, 0.0  ;;  %v828_v24 = vmul.f32 %v800_v11, %v800_v11 }
 0x1bf   :  { %v769_v4 = vadd.f32 %v749_v1, %v721_v52  ;;  %v847_v54 = vsel %vm39_vm1, %v827_v0, 0.0  ;;  %v751_v17 = vpop.xlane.xlu1 %750 }
 0x1c0   :  { %v801_v7 = vld [vmem:[#allocation5 + $0x38] sm:$0xff]  ;;  %v848_v16 = vadd.f32 %v847_v54, %v846_v9  ;;  %v892_v19 = vadd.f32 %v891_v14, %v890_v8  ;;  %v770_v20 = vadd.f32 %v751_v17, %v722_v10  ;;  %v849_v23 = vsel %vm39_vm1, %v828_v24, 0.0 }
 0x1c1   :  { %786 = vst.msk [vmem:[#allocation5 + $0x58] sm:$0xff] %vm39_vm1, %v769_v4  ;;  %v829_v12 = vmul.f32 %v801_v7, %v801_v7  ;;  %v893_v15 = vsel %vm39_vm1, %v801_v7, 0.0  ;;  %v802_v57 = vld [vmem:[#allocation5 + $0x40] sm:$0xff] }
 0x1c2   :  { %v753_v13 = vpop.xlane.xlu0 %752  ;;  %v894_v27 = vadd.f32 %v893_v15, %v892_v19  ;;  %v850_v29 = vadd.f32 %v849_v23, %v848_v16  ;;  %787 = vst.msk [vmem:[#allocation5 + $0x60] sm:$0xff] %vm39_vm1, %v770_v20  ;;  %v895_v31 = vsel %vm39_vm1, %v802_v57, 0.0  ;;  %v830_v33 = vmul.f32 %v802_v57, %v802_v57 }
 0x1c3   :  { %v771_v18 = vadd.f32 %v753_v13, %v723_v55  ;;  %v851_v25 = vsel %vm39_vm1, %v829_v12, 0.0  ;;  %v755_v34 = vpop.xlane.xlu1 %754 }
 0x1c4   :  { %v803_v22 = vld [vmem:[#allocation5 + $0x48] sm:$0xff]  ;;  %v896_v36 = vadd.f32 %v895_v31, %v894_v27  ;;  %v852_v37 = vadd.f32 %v851_v25, %v850_v29  ;;  %v772_v38 = vadd.f32 %v755_v34, %v724_v26  ;;  %v853_v40 = vsel %vm39_vm1, %v830_v33, 0.0 }
 0x1c5   :  { %788 = vst.msk [vmem:[#allocation5 + $0x68] sm:$0xff] %vm39_vm1, %v771_v18  ;;  %v831_v28 = vmul.f32 %v803_v22, %v803_v22  ;;  %v897_v32 = vsel %vm39_vm1, %v803_v22, 0.0  ;;  %v804_v42 = vld [vmem:[#allocation5 + $0x50] sm:$0xff] }
 0x1c6   :  { %v757_v30 = vpop.xlane.xlu0 %756  ;;  %v898_v43 = vadd.f32 %v897_v32, %v896_v36  ;;  %v854_v56 = vadd.f32 %v853_v40, %v852_v37  ;;  %789 = vst.msk [vmem:[#allocation5 + $0x70] sm:$0xff] %vm39_vm1, %v772_v38  ;;  %v899_v45 = vsel %vm39_vm1, %v804_v42, 0.0  ;;  %v832_v47 = vmul.f32 %v804_v42, %v804_v42  ;;  %v545_v37 = vld [vmem:[#allocation2] sm:$0x1]  ;;  %v606_v38 = vld [vmem:[#allocation3] sm:$0x1] }
 0x1c7   :  { %v773_v35 = vadd.f32 %v757_v30, %v725_v21  ;;  %v855_v41 = vsel %vm39_vm1, %v831_v28, 0.0 }
 0x1c8   :  { %v805_v39 = vld [vmem:[#allocation5 + $0x58] sm:$0xff]  ;;  %v900_v48 = vadd.f32 %v899_v45, %v898_v43  ;;  %v856_v49 = vadd.f32 %v855_v41, %v854_v56  ;;  %v857_v51 = vsel %vm39_vm1, %v832_v47, 0.0 }
 0x1c9   :  { %790 = vst.msk [vmem:[#allocation5 + $0x78] sm:$0xff] %vm39_vm1, %v773_v35  ;;  %v833_v44 = vmul.f32 %v805_v39, %v805_v39  ;;  %v901_v46 = vsel %vm39_vm1, %v805_v39, 0.0  ;;  %v594_v53 = vpop.xlane.xlu1 %593  ;;  %v806_v59 = vld [vmem:[#allocation5 + $0x60] sm:$0xff]  ;;  %v666_v43 = vld [vmem:[#allocation4] sm:$0x1] }
 0x1ca   :  { %v655_v58 = vpop.xlane.xlu0 %654  ;;  %v902_v60 = vadd.f32 %v901_v46, %v900_v48  ;;  %v858_v63 = vadd.f32 %v857_v51, %v856_v49  ;;  %v595_v0 = vrot.slane %v594_v53, 4  ;;  %v903_v2 = vsel %vm39_vm1, %v806_v59, 0.0 }
 0x1cb   :  { %v859_v52 = vsel %vm39_vm1, %v833_v44, 0.0  ;;  %v656_v1 = vrot.slane %v655_v58, 4  ;;  %v834_v3 = vmul.f32 %v806_v59, %v806_v59 }
 0x1cc   :  { %v807_v50 = vld [vmem:[#allocation5 + $0x68] sm:$0xff]  ;;  %v904_v4 = vadd.f32 %v903_v2, %v902_v60  ;;  %v860_v5 = vadd.f32 %v859_v52, %v858_v63  ;;  %v596_v54 = vadd.f32 %v595_v0, %v594_v53 }
 0x1cd   :  { %v905_v61 = vsel %vm39_vm1, %v807_v50, 0.0  ;;  %v835_v62 = vmul.f32 %v807_v50, %v807_v50  ;;  %v657_v6 = vadd.f32 %v656_v1, %v655_v58  ;;  %v861_v7 = vsel %vm39_vm1, %v834_v3, 0.0  ;;  %v699_v9 = vpop.xlane.xlu1 %698  ;;  %v808_v10 = vld [vmem:[#allocation5 + $0x70] sm:$0xff] }
 0x1ce   :  { %v906_v11 = vadd.f32 %v905_v61, %v904_v4  ;;  %v862_v14 = vadd.f32 %v861_v7, %v860_v5  ;;  %v597_v15 = vrot.slane %v596_v54, 2  ;;  %v700_v16 = vrot.slane %v699_v9, 4 }
 0x1cf   :  { %v863_v8 = vsel %vm39_vm1, %v835_v62, 0.0  ;;  %v658_v24 = vrot.slane %v657_v6, 2  ;;  %v907_v17 = vsel %vm39_vm1, %v808_v10, 0.0  ;;  %v836_v19 = vmul.f32 %v808_v10, %v808_v10 }
 0x1d0   :  { %v809_v55 = vld [vmem:[#allocation5 + $0x78] sm:$0xff]  ;;  %v908_v18 = vadd.f32 %v907_v17, %v906_v11  ;;  %v864_v20 = vadd.f32 %v863_v8, %v862_v14  ;;  %v701_v21 = vadd.f32 %v700_v16, %v699_v9  ;;  %v598_v22 = vadd.f32 %v597_v15, %v596_v54 }
 0x1d1   :  { %v909_v12 = vsel %vm39_vm1, %v809_v55, 0.0  ;;  %v837_v13 = vmul.f32 %v809_v55, %v809_v55  ;;  %v659_v23 = vadd.f32 %v658_v24, %v657_v6  ;;  %v865_v26 = vsel %vm39_vm1, %v836_v19, 0.0 }
 0x1d2   :  { %v910_v25 = vadd.f32 %v909_v12, %v908_v18  ;;  %v702_v27 = vrot.slane %v701_v21, 2  ;;  %v599_v28 = vrot.slane %v598_v22, 1  ;;  %v866_v29 = vadd.f32 %v865_v26, %v864_v20 }
 0x1d3   :  { %v867_v57 = vsel %vm39_vm1, %v837_v13, 0.0  ;;  %v660_v30 = vrot.slane %v659_v23, 1 }
 0x1d4   :  { %911 = vadd.xlane.f32.xlu1 %v910_v25  ;;  %v600_v31 = vadd.f32 %v599_v28, %v598_v22  ;;  %v868_v32 = vadd.f32 %v867_v57, %v866_v29  ;;  %v703_v34 = vadd.f32 %v702_v27, %v701_v21 }
 0x1d5   :  { %v661_v33 = vadd.f32 %v660_v30, %v659_v23 }
 0x1d6   :  { %1143 = vpush %v600_v31  ;;  %869 = vadd.xlane.f32.xlu0 %v868_v32  ;;  %v704_v35 = vrot.slane %v703_v34, 1 }
 0x1d7   :  { %1145 = vpush %v661_v33 }
 0x1d8   :  { %v705_v36 = vadd.f32 %v704_v35, %v703_v34 }
 0x1da   :  { %1147 = vpush %v705_v36 }
 0x207   :  { %s1144_s4 = spop %1143 }
 0x208   :  { %v602_v39 = vstv %s1144_s4  ;;  %s1146_s5 = spop %1145 }
 0x209   :  { %v603_v40 = vadd.f32 %v602_v39, %v545_v37  ;;  %v663_v41 = vstv %s1146_s5 }
 0x20a   :  { %v664_v42 = vadd.f32 %v663_v41, %v606_v38 }
 0x20b   :  { %605 = vst.msk [vmem:[#allocation2] sm:$0x1] %vm35_vm2, %v603_v40  ;;  %s1148_s20 = spop %1147 }
 0x20c   :  { %665 = vst.msk [vmem:[#allocation3] sm:$0x1] %vm35_vm2, %v664_v42  ;;  %v707_v44 = vstv %s1148_s20 }
 0x20d   :  { %v708_v56 = vadd.f32 %v707_v44, %v666_v43 }
 0x20f   :  { %709 = vst.msk [vmem:[#allocation4] sm:$0x1] %vm35_vm2, %v708_v56 }
 0x212   :  { %v810_v45 = vld [vmem:[#allocation2] sm:$0x1] }
 0x213   :  { %1149 = vpush %v810_v45  ;;  %v814_v46 = vld [vmem:[#allocation3] sm:$0x1] }
 0x214   :  { %1151 = vpush %v814_v46 }
 0x216   :  { %v818_v47 = vld [vmem:[#allocation4] sm:$0x1] }
 0x217   :  { %1153 = vpush %v818_v47 }
 0x244   :  { %s1150_s24 = spop %1149 }
 0x245   :  { %v812_v48 = vstv %s1150_s24  ;;  %s1152_s25 = spop %1151 }
 0x246   :  { %813 = vst [vmem:[#allocation6] sm:$0x1] %v812_v48  ;;  %v816_v49 = vstv %s1152_s25 }
 0x247   :  { %817 = vst [vmem:[#allocation8] sm:$0x1] %v816_v49 }
 0x248   :  { %1211 = shalt.err (!%p1208_p4)
}
 0x249   :  { %931 = dma.vmem_to_hbm [thread:$0]  %s929_s22, 16, %s1835_s6, [#allocation7]  }
 0x24a   :  { %s1154_s30 = spop %1153  ;;  %s1220_s11 = scalar_lea.vmem %s939_s1, 16 }
 0x24b   :  { %v820_v50 = vstv %s1154_s30  ;;  %p1221_p5 = scmp.ne.s32.totalorder %s939_s1, %s1220_s11  ;;  %s1224_s12 = scalar_lea.vmem %s939_s1, 32 }
 0x24c   :  { %p1225_p6 = scmp.lt.s32.totalorder %s939_s1, %s939_s1  ;;  %p1226_p7 = scmp.lt.s32.totalorder %s1224_s12, %s1220_s11 }
 0x24e   :  { %p1227_p8 = por %p1226_p7, %p1225_p6 }
 0x250   :  { %p1228_p9 = pnand %p1227_p8, %p1221_p5 }
 0x252   :  { %1231 = shalt.err (!%p1228_p9)
}
 0x253   :  { %941 = dma.vmem_to_hbm [thread:$0]  %s939_s1, 16, %s1836_s7, [#allocation9]   ;;  %821 = vst [vmem:[#allocation10] sm:$0x1] %v820_v50 }
 0x254   :  { %s1240_s14 = scalar_lea.vmem %s949_s0, 16  ;;  %s1244_s15 = scalar_lea.vmem %s949_s0, 32 }
 0x255   :  { %p1241_p10 = scmp.ne.s32.totalorder %s949_s0, %s1240_s14  ;;  %p1245_p11 = scmp.lt.s32.totalorder %s949_s0, %s949_s0 }
 0x256   :  { %p1246_p12 = scmp.lt.s32.totalorder %s1244_s15, %s1240_s14 }
 0x258   :  { %p1247_p13 = por %p1246_p12, %p1245_p11 }
 0x25a   :  { %p1248_p0 = pnand %p1247_p13, %p1241_p10 }
 0x25c   :  { %1251 = shalt.err (!%p1248_p0)
}
 0x25d   :  { %951 = dma.vmem_to_hbm [thread:$0]  %s949_s0, 16, %s1837_s8, [#allocation9]   ;;  %v912_v51 = vpop.xlane.xlu1 %911 }
 0x25e   :  { %v913_v52 = vrot.slane %v912_v51, 4  ;;  %s1311_s7 = smov [#allocation11]   ;;  %s1312_s18 = smov [#allocation13]  }
 0x25f   :  { %v870_v58 = vpop.xlane.xlu0 %869  ;;  %s958_s17 = sshll.u32 %s1311_s7, 4  ;;  %s968_s8 = sshll.u32 %s1312_s18, 4  ;;  %s959_s17 = int_to_ptr.vmem [resolvable:$true] %s958_s17  ;;  %s969_s8 = int_to_ptr.vmem [resolvable:$true] %s968_s8 }
 0x260   :  { %v914_v53 = vadd.f32 %v913_v52, %v912_v51  ;;  %v871_v59 = vrot.slane %v870_v58, 4  ;;  %s1260_s5 = scalar_lea.vmem %s959_s17, 16  ;;  %s1264_s20 = scalar_lea.vmem %s959_s17, 32 }
 0x261   :  { %p1261_p1 = scmp.ne.s32.totalorder %s959_s17, %s1260_s5  ;;  %p1265_p2 = scmp.lt.s32.totalorder %s959_s17, %s959_s17 }
 0x262   :  { %v915_v60 = vrot.slane %v914_v53, 2  ;;  %v872_v61 = vadd.f32 %v871_v59, %v870_v58  ;;  %p1266_p3 = scmp.lt.s32.totalorder %s1264_s20, %s1260_s5 }
 0x264   :  { %v916_v62 = vadd.f32 %v915_v60, %v914_v53  ;;  %v873_v63 = vrot.slane %v872_v61, 2  ;;  %p1267_p4 = por %p1266_p3, %p1265_p2 }
 0x266   :  { %v874_v0 = vadd.f32 %v873_v63, %v872_v61  ;;  %v917_v1 = vrot.slane %v916_v62, 1  ;;  %p1268_p5 = pnand %p1267_p4, %p1261_p1 }
 0x268   :  { %v875_v2 = vrot.slane %v874_v0, 1  ;;  %v918_v4 = vadd.f32 %v917_v1, %v916_v62 }
 0x26a   :  { %v876_v3 = vadd.f32 %v875_v2, %v874_v0 }
 0x26c   :  { %1155 = vpush %v876_v3 }
 0x26d   :  { %1157 = vpush %v918_v4 }
 0x29d   :  { %s1156_s19 = spop %1155 }
 0x29e   :  { %v878_v5 = vstv %s1156_s19  ;;  %s1158_s4 = spop %1157 }
 0x29f   :  { %879 = vst [vmem:[#allocation11] sm:$0x1] %v878_v5  ;;  %v920_v54 = vstv %s1158_s4 }
 0x2a0   :  { %921 = vst [vmem:[#allocation13] sm:$0x1] %v920_v54 }
 0x2a1   :  { %1271 = shalt.err (!%p1268_p5)
}
 0x2a2   :  { %961 = dma.vmem_to_hbm [thread:$0]  %s959_s17, 16, %s1838_s9, [#allocation12]  }
 0x2a3   :  { %s1280_s23 = scalar_lea.vmem %s969_s8, 16  ;;  %s1284_s1 = scalar_lea.vmem %s969_s8, 32 }
 0x2a4   :  { %p1281_p6 = scmp.ne.s32.totalorder %s969_s8, %s1280_s23  ;;  %p1285_p7 = scmp.lt.s32.totalorder %s969_s8, %s969_s8 }
 0x2a5   :  { %p1286_p8 = scmp.lt.s32.totalorder %s1284_s1, %s1280_s23 }
 0x2a7   :  { %p1287_p9 = por %p1286_p8, %p1285_p7 }
 0x2a9   :  { %p1288_p10 = pnand %p1287_p9, %p1281_p6 }
 0x2ab   :  { %1291 = shalt.err (!%p1288_p10)
}
 0x2ac   :  { %971 = dma.vmem_to_hbm [thread:$0]  %s969_s8, 16, %s1839_s10, [#allocation12]  }
 0x2ad   :  { %1300 = dma.done.wait [#allocation7], 16  }
 0x2ae   :  { %1301 = vsyncadd [#allocation7], 4294967280 }
 0x2af   :  { %1302 = dma.done.wait [#allocation9], 32  }
 0x2b0   :  { %1303 = vsyncadd [#allocation9], 4294967264 }
 0x2b1   :  { %1304 = dma.done.wait [#allocation12], 32  }
 0x2b2   :  { %1305 = vsyncadd [#allocation12], 4294967264 }
 0x2b3   :  { %987 = vsyncpa [#allocation7], 1 }
 0x2b4   :  { %988 = vsyncpa [#allocation9], 1 }
 0x2b5   :  { %989 = vsyncpa [#allocation12], 1 }

</bundles_post_ra>
